<compile_context>
chip_gen: v6e
topology: v6e:2x2x1
jax: 0.10.0
libtpu: 0.0.40
codegen_flags: <defaults>
</compile_context>

<pallas_src>
import math

import jax
import jax.numpy as jnp
from jax.experimental import pallas as pl
from jax.experimental.pallas import tpu as pltpu

# ----------------------------- KAN constants --------------------------------
GRID_SIZE = 5
SPLINE_ORDER = 3
NUM_BASIS = GRID_SIZE + SPLINE_ORDER              # 8
NUM_GRID_PTS = GRID_SIZE + 2 * SPLINE_ORDER + 1   # 12
GRID_RANGE = (-1.0, 1.0)
KNOT_H = (GRID_RANGE[1] - GRID_RANGE[0]) / GRID_SIZE                  # 0.4
KNOTS = tuple(GRID_RANGE[0] + (j - SPLINE_ORDER) * KNOT_H
              for j in range(NUM_GRID_PTS))                           # 12 floats

F_PAD = 128      # lane-dense width for node features / GCN weights
PROJ_PAD = 128   # lane-dense width for the projection output
EMB_PAD_UNIT = F_PAD // NUM_BASIS   # 16 -> NUM_BASIS*emb_pad is a multiple of 128


def _pad2(a, shape):
    return jnp.pad(a, [(0, t - s) for s, t in zip(a.shape, shape)])


def _round_up(v, m):
    return ((v + m - 1) // m) * m


# =============================================================================
# Fused Pallas kernel: grid = (layer, node-row tile)
# =============================================================================
def make_graph_encoder_kernel(nlayers, tm, emb_pad):
    last = nlayers - 1

    def kernel(x_ref, adj_ref, w_ref, b_ref, base_wt_ref, spline_ref,
               z_ref, emb_ref, xcur_ref, h_ref, bases_ref):
        l = pl.program_id(0)     # GCN layer (sequential dependence)
        r = pl.program_id(1)     # node-row tile (sequential within a layer)

        # Load the padded input features into the resident activation buffer.
        @pl.when(jnp.logical_and(l == 0, r == 0))
        def _():
            xcur_ref[...] = x_ref[...]

        # Once per layer: h = x @ W_l + b_l  (dropout p=0 in eval -> identity).
        @pl.when(r == 0)
        def _():
            h_ref[...] = (
                jnp.dot(xcur_ref[...], w_ref[0],
                        preferred_element_type=jnp.float32) + b_ref[0])

        # Row tile of A @ h; the next adj row tile is DMA'd in the background
        # by the BlockSpec pipeline while this matmul runs.
        rows = jnp.dot(adj_ref[...], h_ref[...],
                       preferred_element_type=jnp.float32)        # (tm, F_PAD)

        row0 = pl.multiple_of(r * tm, tm)
        xcur_ref[pl.ds(row0, tm), :] = rows

        # ----- last layer: emit x_emb rows and run the KANLinear head -------
        @pl.when(l == last)
        def _():
            emb_ref[...] = rows.astype(emb_ref.dtype)
            x = rows

            # Base path: SiLU(x) @ base_w^T.
            out = jnp.dot(x * jax.nn.sigmoid(x), base_wt_ref[...],
                          preferred_element_type=jnp.float32)

            # B-spline bases.  Uniform grid constant-folded; the 12 knot
            # comparisons are computed once and reused (order-0 = ge & ~ge+1).
            ge = [x >= KNOTS[j] for j in range(NUM_GRID_PTS)]
            bases = [
                jnp.logical_and(ge[j], jnp.logical_not(ge[j + 1]))
                   .astype(jnp.float32)
                for j in range(NUM_GRID_PTS - 1)
            ]
            for k in range(1, SPLINE_ORDER + 1):
                inv = 1.0 / (k * KNOT_H)          # g(j+k) - g(j) == k*h
                xs = x * inv
                bases = [
                    (xs - KNOTS[j] * inv) * bases[j]
                    + (KNOTS[j + k + 1] * inv - xs) * bases[j + 1]
                    for j in range(len(bases) - 1)
                ]                                 # len == NUM_BASIS at the end

            # Pack only the first emb_pad lanes of each basis so the spline
            # path is a single K = NUM_BASIS*emb_pad contraction (128 for
            # emb_dim=16) instead of K = NUM_BASIS*128 = 1024.
            for c in range(NUM_BASIS):
                bases_ref[:, c * emb_pad:(c + 1) * emb_pad] = (
                    bases[c][:, :emb_pad])

            out = out + jnp.dot(bases_ref[...], spline_ref[...],
                                preferred_element_type=jnp.float32)
            z_ref[...] = out.astype(z_ref.dtype)

    return kernel


def _vmem_budget_bytes(n, tm, k_spline):
    f4 = 4
    b = 2 * tm * n * f4                       # adj row tiles (double-buffered)
    b += 2 * n * F_PAD * f4                   # x input
    b += 2 * (F_PAD * F_PAD + F_PAD) * f4     # stacked (W_l, b_l) blocks
    b += 2 * F_PAD * PROJ_PAD * f4            # base_w^T
    b += 2 * k_spline * PROJ_PAD * f4         # packed spline matrix
    b += 2 * tm * (PROJ_PAD + F_PAD) * f4     # z / x_emb output blocks
    b += 2 * n * F_PAD * f4                   # x_cur + h scratch
    b += tm * k_spline * f4                   # packed-bases scratch
    return b


def graph_encoder_forward(x, adj, gcn_params, kan_params):
    """Fused GraphEncoder forward.  Returns (z, x_emb) with true (unpadded) dims."""
    n, in_dim = x.shape
    assert n % 8 == 0, "number of nodes must be a multiple of 8"
    nlayers = len(gcn_params)
    emb_dim = gcn_params[-1]["w"].shape[1]
    proj_dim = kan_params["base_w"].shape[0]
    emb_pad = kan_params["emb_pad"]
    k_spline = NUM_BASIS * emb_pad
    assert max(in_dim, emb_dim, proj_dim) <= F_PAD

    # Node-row tile: a multiple of 8 that divides N (N itself for small graphs).
    tm = math.gcd(n, 256)
    nt = n // tm

    x_p = _pad2(x, (n, F_PAD)).astype(jnp.float32)
    w_stack = jnp.stack([p["w_pad"] for p in gcn_params])        # (L, 128, 128)
    b_stack = jnp.stack([p["b_pad"] for p in gcn_params])        # (L, 1, 128)

    # Explicit VMEM budget (review: re-derive against v7x's 64 MiB).
    vmem_limit = max(int(1.25 * _vmem_budget_bytes(n, tm, k_spline)) + (4 << 20),
                     32 << 20)

    z_p, emb_p = pl.pallas_call(
        make_graph_encoder_kernel(nlayers, tm, emb_pad),
        out_shape=(jax.ShapeDtypeStruct((n, PROJ_PAD), jnp.float32),
                   jax.ShapeDtypeStruct((n, F_PAD), jnp.float32)),
        grid_spec=pltpu.PrefetchScalarGridSpec(
            num_scalar_prefetch=0,
            grid=(nlayers, nt),
            in_specs=[
                pl.BlockSpec((n, F_PAD), lambda l, r: (0, 0)),             # x (fetched once)
                pl.BlockSpec((tm, n), lambda l, r: (r, 0)),                # adj row tiles
                pl.BlockSpec((1, F_PAD, F_PAD), lambda l, r: (l, 0, 0)),   # W_l
                pl.BlockSpec((1, 1, F_PAD), lambda l, r: (l, 0, 0)),       # b_l
                pl.BlockSpec((F_PAD, PROJ_PAD), lambda l, r: (0, 0)),      # base_w^T
                pl.BlockSpec((k_spline, PROJ_PAD), lambda l, r: (0, 0)),   # spline mat
            ],
            out_specs=[
                pl.BlockSpec((tm, PROJ_PAD), lambda l, r: (r, 0)),         # z
                pl.BlockSpec((tm, F_PAD), lambda l, r: (r, 0)),            # x_emb
            ],
            scratch_shapes=[
                pltpu.VMEM((n, F_PAD), jnp.float32),        # resident activations
                pltpu.VMEM((n, F_PAD), jnp.float32),        # h = xW + b (per layer)
                pltpu.VMEM((tm, k_spline), jnp.float32),    # packed spline bases
            ]),
        compiler_params=pltpu.CompilerParams(
            # Both axes are sequential: layer l+1 needs all rows of layer l,
            # and all row tiles of a layer share the h scratch.
            dimension_semantics=("arbitrary", "arbitrary"),
            vmem_limit_bytes=vmem_limit),
    )(x_p, adj.astype(jnp.float32), w_stack, b_stack,
      kan_params["base_wt_pad"], kan_params["spline_mat_pad"])

    return z_p[:, :proj_dim], emb_p[:, :emb_dim]


# =============================================================================
# Parameter construction (deterministic, synthetic) + kernel layouts
# =============================================================================
def init_gcn_layer(key, fin, fout):
    kw, kb = jax.random.split(key)
    bound = 1.0 / math.sqrt(fin)
    w = jax.random.uniform(kw, (fin, fout), jnp.float32, -bound, bound)
    b = jax.random.uniform(kb, (1, fout), jnp.float32, -bound, bound)
    return dict(w=w, b=b,
                w_pad=_pad2(w, (F_PAD, F_PAD)),     # zero-padded (lane-dense)
                b_pad=_pad2(b, (1, F_PAD)))


def init_kan_layer(key, fin, fout):
    k1, k2, k3 = jax.random.split(key, 3)
    base_w = jax.random.uniform(k1, (fout, fin), jnp.float32, -0.5, 0.5)
    spline_w = jax.random.uniform(k2, (fout, fin, NUM_BASIS), jnp.float32, -0.1, 0.1)
    scaler = jax.random.uniform(k3, (fout, fin), jnp.float32, 0.5, 1.5)
    scaled_spline_w = spline_w * scaler[:, :, None]            # (OUT, IN, 8)

    # Uniform grid kept only for the pure-JAX reference (kernel constant-folds it).
    knots = (jnp.arange(-SPLINE_ORDER, GRID_SIZE + SPLINE_ORDER + 1,
                        dtype=jnp.float32) * KNOT_H + GRID_RANGE[0])     # (12,)
    grid = jnp.tile(knots[None, :], (fin, 1))                            # (IN, 12)

    # Kernel layouts (packed spline contraction, review item):
    #   base_wt_pad[i, o]                = base_w[o, i]            (128, 128)
    #   spline_mat_pad[c*emb_pad + i, o] = scaled_spline_w[o, i, c]
    emb_pad = _round_up(fin, EMB_PAD_UNIT)          # K = 8*emb_pad, multiple of 128
    base_wt_pad = _pad2(base_w.T, (F_PAD, PROJ_PAD))
    ssw_pad = jnp.pad(scaled_spline_w,
                      ((0, PROJ_PAD - fout), (0, emb_pad - fin), (0, 0)))
    spline_mat_pad = jnp.transpose(ssw_pad, (2, 1, 0)).reshape(
        NUM_BASIS * emb_pad, PROJ_PAD)
    return dict(grid=grid, base_w=base_w, scaled_spline_w=scaled_spline_w,
                emb_pad=emb_pad, base_wt_pad=base_wt_pad,
                spline_mat_pad=spline_mat_pad)


# =============================================================================
# Pure-JAX reference (mirrors the PyTorch module)
# =============================================================================
def _kan_ref(x, grid, base_w, scaled_sw):
    xe = x[:, :, None]
    bases = jnp.logical_and(xe >= grid[None, :, :-1],
                            xe < grid[None, :, 1:]).astype(x.dtype)
    for k in range(1, SPLINE_ORDER + 1):
        bases = ((xe - grid[None, :, :-(k + 1)])
                 / (grid[None, :, k:-1] - grid[None, :, :-(k + 1)]) * bases[:, :, :-1]
                 + (grid[None, :, k + 1:] - xe)
                 / (grid[None, :, k + 1:] - grid[None, :, 1:-k]) * bases[:, :, 1:])
    base_out = jax.nn.silu(x) @ base_w.T
    spline_out = bases.reshape(x.shape[0], -1) @ scaled_sw.reshape(
        scaled_sw.shape[0], -1).T
    return base_out + spline_out


def graph_encoder_ref(x, adj, gcn_params, kan_params):
    for p in gcn_params[:-1]:
        x = adj @ (x @ p["w"] + p["b"])
    p = gcn_params[-1]
    x_emb = adj @ (x @ p["w"] + p["b"])
    z = _kan_ref(x_emb, kan_params["grid"], kan_params["base_w"],
                 kan_params["scaled_spline_w"])
    return z, x_emb


# =============================================================================
if __name__ == "__main__":
    key = jax.random.PRNGKey(0)

    # Small shapes consistent with the module.
    N = 16          # number of graph nodes (multiple of 8)
    IN_DIM = 8
    HIDDEN_DIM = 32
    EMB_DIM = 16
    PROJ_DIM = 16
    NLAYERS = 3     # in->hidden, hidden->hidden, hidden->emb

    kx, ka, k0, k1, k2, kkan = jax.random.split(key, 6)

    x = jax.random.normal(kx, (N, IN_DIM), jnp.float32)

    # Symmetric binary adjacency (self-loops included).
    upper = (jax.random.uniform(ka, (N, N)) < 0.3).astype(jnp.float32)
    adj = jnp.clip(upper + upper.T + jnp.eye(N, dtype=jnp.float32), 0.0, 1.0)

    gcn_params = [
        init_gcn_layer(k0, IN_DIM, HIDDEN_DIM),
        init_gcn_layer(k1, HIDDEN_DIM, HIDDEN_DIM),
        init_gcn_layer(k2, HIDDEN_DIM, EMB_DIM),
    ]
    kan_params = init_kan_layer(kkan, EMB_DIM, PROJ_DIM)

    z, x_emb = graph_encoder_forward(x, adj, gcn_params, kan_params)
    z = jax.block_until_ready(z)
    x_emb = jax.block_until_ready(x_emb)

    z_ref, x_emb_ref = graph_encoder_ref(x, adj, gcn_params, kan_params)
    assert z.shape == (N, PROJ_DIM) and x_emb.shape == (N, EMB_DIM)
    assert jnp.allclose(x_emb, x_emb_ref, rtol=1e-4, atol=1e-4), \
        float(jnp.max(jnp.abs(x_emb - x_emb_ref)))
    assert jnp.allclose(z, z_ref, rtol=1e-4, atol=1e-4), \
        float(jnp.max(jnp.abs(z - z_ref)))

    print("KERNEL_OK")
</pallas_src>

<mosaic_0001>
module attributes {stable_mosaic.version = 11 : i64} {
  func.func @kernel(%arg0: i32, %arg1: i32, %arg2: memref<16x128xf32, #tpu.memory_space<vmem>>, %arg3: memref<16x16xf32, #tpu.memory_space<vmem>>, %arg4: memref<1x128x128xf32, #tpu.memory_space<vmem>>, %arg5: memref<1x1x128xf32, #tpu.memory_space<vmem>>, %arg6: memref<128x128xf32, #tpu.memory_space<vmem>>, %arg7: memref<128x128xf32, #tpu.memory_space<vmem>>, %arg8: memref<16x128xf32, #tpu.memory_space<vmem>>, %arg9: memref<16x128xf32, #tpu.memory_space<vmem>>, %arg10: memref<16x128xf32, #tpu.memory_space<vmem>>, %arg11: memref<16x128xf32, #tpu.memory_space<vmem>>, %arg12: memref<16x128xf32, #tpu.memory_space<vmem>>) attributes {dimension_semantics = [#tpu.dimension_semantics<arbitrary>, #tpu.dimension_semantics<arbitrary>], iteration_bounds = array<i64: 3, 1>, scalar_prefetch = 0 : i64, scratch_operands = 3 : i64, tpu.core_type = #tpu.core_type<tc>, window_params = [{pipeline_mode = #tpu.pipeline_mode<synchronous>, transform_indices = @transform_0, window_bounds = array<i64: 16, 128>}, {transform_indices = @transform_1, window_bounds = array<i64: 16, 16>}, {transform_indices = @transform_2, window_bounds = array<i64: 1, 128, 128>}, {transform_indices = @transform_3, window_bounds = array<i64: 1, 1, 128>}, {pipeline_mode = #tpu.pipeline_mode<synchronous>, transform_indices = @transform_4, window_bounds = array<i64: 128, 128>}, {pipeline_mode = #tpu.pipeline_mode<synchronous>, transform_indices = @transform_5, window_bounds = array<i64: 128, 128>}, {transform_indices = @transform_6, window_bounds = array<i64: 16, 128>}, {transform_indices = @transform_7, window_bounds = array<i64: 16, 128>}]} {
    %c0_i32 = arith.constant 0 : i32
    %0 = arith.cmpi eq, %arg0, %c0_i32 : i32
    %c0_i32_0 = arith.constant 0 : i32
    %1 = arith.cmpi eq, %arg1, %c0_i32_0 : i32
    %2 = arith.andi %0, %1 : i1
    %3 = arith.extui %2 : i1 to i32
    %c0_i32_1 = arith.constant 0 : i32
    %4 = arith.cmpi ne, %3, %c0_i32_1 : i32
    scf.if %4 {
      %c0_9 = arith.constant 0 : index
      %c0_10 = arith.constant 0 : index
      %18 = vector.load %arg2[%c0_9, %c0_10] : memref<16x128xf32, #tpu.memory_space<vmem>>, vector<16x128xf32>
      %c0_11 = arith.constant 0 : index
      %c0_12 = arith.constant 0 : index
      %19 = vector.load %arg10[%c0_11, %c0_12] : memref<16x128xf32, #tpu.memory_space<vmem>>, vector<16x128xf32>
      tpu.vector_store %arg10[%c0_11, %c0_12], %18 {strides = array<i32>} : memref<16x128xf32, #tpu.memory_space<vmem>>, vector<16x128xf32>,
    } else {
    }
    %c0_i32_2 = arith.constant 0 : i32
    %5 = arith.cmpi eq, %arg1, %c0_i32_2 : i32
    %6 = arith.extui %5 : i1 to i32
    %c0_i32_3 = arith.constant 0 : i32
    %7 = arith.cmpi ne, %6, %c0_i32_3 : i32
    scf.if %7 {
      %c0_9 = arith.constant 0 : index
      %c0_10 = arith.constant 0 : index
      %18 = vector.load %arg10[%c0_9, %c0_10] : memref<16x128xf32, #tpu.memory_space<vmem>>, vector<16x128xf32>
      %c0_11 = arith.constant 0 : index
      %c0_12 = arith.constant 0 : index
      %c0_13 = arith.constant 0 : index
      %19 = vector.load %arg4[%c0_11, %c0_12, %c0_13] : memref<1x128x128xf32, #tpu.memory_space<vmem>>, vector<1x128x128xf32>
      %20 = vector.shape_cast %19 : vector<1x128x128xf32> to vector<128x128xf32>
      %cst_14 = arith.constant dense<0.000000e+00> : vector<16x128xf32>
      %21 = tpu.matmul %18, %20, %cst_14 {dimension_numbers = #tpu.dot_dimension_numbers<[1], [0], [0], [1], [0, 0, 1, 1], [], []>} : vector<16x128xf32>, vector<128x128xf32>, vector<16x128xf32> -> vector<16x128xf32>
      %c0_15 = arith.constant 0 : index
      %c0_16 = arith.constant 0 : index
      %c0_17 = arith.constant 0 : index
      %22 = vector.load %arg5[%c0_15, %c0_16, %c0_17] : memref<1x1x128xf32, #tpu.memory_space<vmem>>, vector<1x1x128xf32>
      %23 = vector.shape_cast %22 : vector<1x1x128xf32> to vector<1x128xf32>
      %24 = vector.broadcast %23 : vector<1x128xf32> to vector<16x128xf32>
      %25 = arith.addf %21, %24 : vector<16x128xf32>
      %c0_18 = arith.constant 0 : index
      %c0_19 = arith.constant 0 : index
      %26 = vector.load %arg11[%c0_18, %c0_19] : memref<16x128xf32, #tpu.memory_space<vmem>>, vector<16x128xf32>
      tpu.vector_store %arg11[%c0_18, %c0_19], %25 {strides = array<i32>} : memref<16x128xf32, #tpu.memory_space<vmem>>, vector<16x128xf32>,
    } else {
    }
    %c0 = arith.constant 0 : index
    %c0_4 = arith.constant 0 : index
    %8 = vector.load %arg3[%c0, %c0_4] : memref<16x16xf32, #tpu.memory_space<vmem>>, vector<16x16xf32>
    %c0_5 = arith.constant 0 : index
    %c0_6 = arith.constant 0 : index
    %9 = vector.load %arg11[%c0_5, %c0_6] : memref<16x128xf32, #tpu.memory_space<vmem>>, vector<16x128xf32>
    %cst = arith.constant dense<0.000000e+00> : vector<16x128xf32>
    %10 = tpu.matmul %8, %9, %cst {dimension_numbers = #tpu.dot_dimension_numbers<[1], [0], [0], [1], [0, 0, 1, 1], [], []>} : vector<16x16xf32>, vector<16x128xf32>, vector<16x128xf32> -> vector<16x128xf32>
    %c16_i32 = arith.constant 16 : i32
    %11 = arith.muli %arg1, %c16_i32 : i32
    %12 = tpu.assume_multiple %11, 16 : i32
    %13 = arith.index_cast %12 : i32 to index
    %c0_7 = arith.constant 0 : index
    %14 = vector.load %arg10[%13, %c0_7] : memref<16x128xf32, #tpu.memory_space<vmem>>, vector<16x128xf32>
    tpu.vector_store %arg10[%13, %c0_7], %10 {strides = array<i32>} : memref<16x128xf32, #tpu.memory_space<vmem>>, vector<16x128xf32>,
    %c2_i32 = arith.constant 2 : i32
    %15 = arith.cmpi eq, %arg0, %c2_i32 : i32
    %16 = arith.extui %15 : i1 to i32
    %c0_i32_8 = arith.constant 0 : i32
    %17 = arith.cmpi ne, %16, %c0_i32_8 : i32
    scf.if %17 {
      %c0_9 = arith.constant 0 : index
      %c0_10 = arith.constant 0 : index
      %18 = vector.load %arg9[%c0_9, %c0_10] : memref<16x128xf32, #tpu.memory_space<vmem>>, vector<16x128xf32>
      tpu.vector_store %arg9[%c0_9, %c0_10], %10 {strides = array<i32>} : memref<16x128xf32, #tpu.memory_space<vmem>>, vector<16x128xf32>,
      %19 = arith.negf %10 : vector<16x128xf32>
      %20 = math.exp %19 : vector<16x128xf32>
      %cst_11 = arith.constant 1.000000e+00 : f32
      %21 = vector.broadcast %cst_11 : f32 to vector<16x128xf32>
      %22 = arith.addf %21, %20 : vector<16x128xf32>
      %23 = arith.divf %21, %22 : vector<16x128xf32>
      %24 = arith.mulf %10, %23 : vector<16x128xf32>
      %c0_12 = arith.constant 0 : index
      %c0_13 = arith.constant 0 : index
      %25 = vector.load %arg6[%c0_12, %c0_13] : memref<128x128xf32, #tpu.memory_space<vmem>>, vector<128x128xf32>
      %cst_14 = arith.constant dense<0.000000e+00> : vector<16x128xf32>
      %26 = tpu.matmul %24, %25, %cst_14 {dimension_numbers = #tpu.dot_dimension_numbers<[1], [0], [0], [1], [0, 0, 1, 1], [], []>} : vector<16x128xf32>, vector<128x128xf32>, vector<16x128xf32> -> vector<16x128xf32>
      %cst_15 = arith.constant -2.200000e+00 : f32
      %27 = vector.broadcast %cst_15 : f32 to vector<16x128xf32>
      %28 = arith.cmpf oge, %10, %27 : vector<16x128xf32>
      %cst_16 = arith.constant -1.800000e+00 : f32
      %29 = vector.broadcast %cst_16 : f32 to vector<16x128xf32>
      %30 = arith.cmpf oge, %10, %29 : vector<16x128xf32>
      %cst_17 = arith.constant -1.400000e+00 : f32
      %31 = vector.broadcast %cst_17 : f32 to vector<16x128xf32>
      %32 = arith.cmpf oge, %10, %31 : vector<16x128xf32>
      %cst_18 = arith.constant -1.000000e+00 : f32
      %33 = vector.broadcast %cst_18 : f32 to vector<16x128xf32>
      %34 = arith.cmpf oge, %10, %33 : vector<16x128xf32>
      %cst_19 = arith.constant -6.000000e-01 : f32
      %35 = vector.broadcast %cst_19 : f32 to vector<16x128xf32>
      %36 = arith.cmpf oge, %10, %35 : vector<16x128xf32>
      %cst_20 = arith.constant -2.000000e-01 : f32
      %37 = vector.broadcast %cst_20 : f32 to vector<16x128xf32>
      %38 = arith.cmpf oge, %10, %37 : vector<16x128xf32>
      %cst_21 = arith.constant 2.000000e-01 : f32
      %39 = vector.broadcast %cst_21 : f32 to vector<16x128xf32>
      %40 = arith.cmpf oge, %10, %39 : vector<16x128xf32>
      %cst_22 = arith.constant 6.000000e-01 : f32
      %41 = vector.broadcast %cst_22 : f32 to vector<16x128xf32>
      %42 = arith.cmpf oge, %10, %41 : vector<16x128xf32>
      %cst_23 = arith.constant 1.000000e+00 : f32
      %43 = vector.broadcast %cst_23 : f32 to vector<16x128xf32>
      %44 = arith.cmpf oge, %10, %43 : vector<16x128xf32>
      %cst_24 = arith.constant 1.400000e+00 : f32
      %45 = vector.broadcast %cst_24 : f32 to vector<16x128xf32>
      %46 = arith.cmpf oge, %10, %45 : vector<16x128xf32>
      %cst_25 = arith.constant 1.800000e+00 : f32
      %47 = vector.broadcast %cst_25 : f32 to vector<16x128xf32>
      %48 = arith.cmpf oge, %10, %47 : vector<16x128xf32>
      %cst_26 = arith.constant 2.200000e+00 : f32
      %49 = vector.broadcast %cst_26 : f32 to vector<16x128xf32>
      %50 = arith.cmpf oge, %10, %49 : vector<16x128xf32>
      %cst_27 = arith.constant dense<true> : vector<16x128xi1>
      %51 = arith.xori %30, %cst_27 : vector<16x128xi1>
      %52 = arith.andi %28, %51 : vector<16x128xi1>
      %53 = arith.extui %52 : vector<16x128xi1> to vector<16x128xi32>
      %54 = arith.sitofp %53 : vector<16x128xi32> to vector<16x128xf32>
      %cst_28 = arith.constant dense<true> : vector<16x128xi1>
      %55 = arith.xori %32, %cst_28 : vector<16x128xi1>
      %56 = arith.andi %30, %55 : vector<16x128xi1>
      %57 = arith.extui %56 : vector<16x128xi1> to vector<16x128xi32>
      %58 = arith.sitofp %57 : vector<16x128xi32> to vector<16x128xf32>
      %cst_29 = arith.constant dense<true> : vector<16x128xi1>
      %59 = arith.xori %34, %cst_29 : vector<16x128xi1>
      %60 = arith.andi %32, %59 : vector<16x128xi1>
      %61 = arith.extui %60 : vector<16x128xi1> to vector<16x128xi32>
      %62 = arith.sitofp %61 : vector<16x128xi32> to vector<16x128xf32>
      %cst_30 = arith.constant dense<true> : vector<16x128xi1>
      %63 = arith.xori %36, %cst_30 : vector<16x128xi1>
      %64 = arith.andi %34, %63 : vector<16x128xi1>
      %65 = arith.extui %64 : vector<16x128xi1> to vector<16x128xi32>
      %66 = arith.sitofp %65 : vector<16x128xi32> to vector<16x128xf32>
      %cst_31 = arith.constant dense<true> : vector<16x128xi1>
      %67 = arith.xori %38, %cst_31 : vector<16x128xi1>
      %68 = arith.andi %36, %67 : vector<16x128xi1>
      %69 = arith.extui %68 : vector<16x128xi1> to vector<16x128xi32>
      %70 = arith.sitofp %69 : vector<16x128xi32> to vector<16x128xf32>
      %cst_32 = arith.constant dense<true> : vector<16x128xi1>
      %71 = arith.xori %40, %cst_32 : vector<16x128xi1>
      %72 = arith.andi %38, %71 : vector<16x128xi1>
      %73 = arith.extui %72 : vector<16x128xi1> to vector<16x128xi32>
      %74 = arith.sitofp %73 : vector<16x128xi32> to vector<16x128xf32>
      %cst_33 = arith.constant dense<true> : vector<16x128xi1>
      %75 = arith.xori %42, %cst_33 : vector<16x128xi1>
      %76 = arith.andi %40, %75 : vector<16x128xi1>
      %77 = arith.extui %76 : vector<16x128xi1> to vector<16x128xi32>
      %78 = arith.sitofp %77 : vector<16x128xi32> to vector<16x128xf32>
      %cst_34 = arith.constant dense<true> : vector<16x128xi1>
      %79 = arith.xori %44, %cst_34 : vector<16x128xi1>
      %80 = arith.andi %42, %79 : vector<16x128xi1>
      %81 = arith.extui %80 : vector<16x128xi1> to vector<16x128xi32>
      %82 = arith.sitofp %81 : vector<16x128xi32> to vector<16x128xf32>
      %cst_35 = arith.constant dense<true> : vector<16x128xi1>
      %83 = arith.xori %46, %cst_35 : vector<16x128xi1>
      %84 = arith.andi %44, %83 : vector<16x128xi1>
      %85 = arith.extui %84 : vector<16x128xi1> to vector<16x128xi32>
      %86 = arith.sitofp %85 : vector<16x128xi32> to vector<16x128xf32>
      %cst_36 = arith.constant dense<true> : vector<16x128xi1>
      %87 = arith.xori %48, %cst_36 : vector<16x128xi1>
      %88 = arith.andi %46, %87 : vector<16x128xi1>
      %89 = arith.extui %88 : vector<16x128xi1> to vector<16x128xi32>
      %90 = arith.sitofp %89 : vector<16x128xi32> to vector<16x128xf32>
      %cst_37 = arith.constant dense<true> : vector<16x128xi1>
      %91 = arith.xori %50, %cst_37 : vector<16x128xi1>
      %92 = arith.andi %48, %91 : vector<16x128xi1>
      %93 = arith.extui %92 : vector<16x128xi1> to vector<16x128xi32>
      %94 = arith.sitofp %93 : vector<16x128xi32> to vector<16x128xf32>
      %cst_38 = arith.constant 2.500000e+00 : f32
      %95 = vector.broadcast %cst_38 : f32 to vector<16x128xf32>
      %96 = arith.mulf %10, %95 : vector<16x128xf32>
      %cst_39 = arith.constant -5.500000e+00 : f32
      %97 = vector.broadcast %cst_39 : f32 to vector<16x128xf32>
      %98 = arith.subf %96, %97 : vector<16x128xf32>
      %99 = arith.mulf %98, %54 : vector<16x128xf32>
      %cst_40 = arith.constant -3.500000e+00 : f32
      %100 = vector.broadcast %cst_40 : f32 to vector<16x128xf32>
      %101 = arith.subf %100, %96 : vector<16x128xf32>
      %102 = arith.mulf %101, %58 : vector<16x128xf32>
      %103 = arith.addf %99, %102 : vector<16x128xf32>
      %cst_41 = arith.constant -4.500000e+00 : f32
      %104 = vector.broadcast %cst_41 : f32 to vector<16x128xf32>
      %105 = arith.subf %96, %104 : vector<16x128xf32>
      %106 = arith.mulf %105, %58 : vector<16x128xf32>
      %cst_42 = arith.constant -2.500000e+00 : f32
      %107 = vector.broadcast %cst_42 : f32 to vector<16x128xf32>
      %108 = arith.subf %107, %96 : vector<16x128xf32>
      %109 = arith.mulf %108, %62 : vector<16x128xf32>
      %110 = arith.addf %106, %109 : vector<16x128xf32>
      %cst_43 = arith.constant -3.500000e+00 : f32
      %111 = vector.broadcast %cst_43 : f32 to vector<16x128xf32>
      %112 = arith.subf %96, %111 : vector<16x128xf32>
      %113 = arith.mulf %112, %62 : vector<16x128xf32>
      %cst_44 = arith.constant -1.500000e+00 : f32
      %114 = vector.broadcast %cst_44 : f32 to vector<16x128xf32>
      %115 = arith.subf %114, %96 : vector<16x128xf32>
      %116 = arith.mulf %115, %66 : vector<16x128xf32>
      %117 = arith.addf %113, %116 : vector<16x128xf32>
      %cst_45 = arith.constant -2.500000e+00 : f32
      %118 = vector.broadcast %cst_45 : f32 to vector<16x128xf32>
      %119 = arith.subf %96, %118 : vector<16x128xf32>
      %120 = arith.mulf %119, %66 : vector<16x128xf32>
      %cst_46 = arith.constant -5.000000e-01 : f32
      %121 = vector.broadcast %cst_46 : f32 to vector<16x128xf32>
      %122 = arith.subf %121, %96 : vector<16x128xf32>
      %123 = arith.mulf %122, %70 : vector<16x128xf32>
      %124 = arith.addf %120, %123 : vector<16x128xf32>
      %cst_47 = arith.constant -1.500000e+00 : f32
      %125 = vector.broadcast %cst_47 : f32 to vector<16x128xf32>
      %126 = arith.subf %96, %125 : vector<16x128xf32>
      %127 = arith.mulf %126, %70 : vector<16x128xf32>
      %cst_48 = arith.constant 5.000000e-01 : f32
      %128 = vector.broadcast %cst_48 : f32 to vector<16x128xf32>
      %129 = arith.subf %128, %96 : vector<16x128xf32>
      %130 = arith.mulf %129, %74 : vector<16x128xf32>
      %131 = arith.addf %127, %130 : vector<16x128xf32>
      %cst_49 = arith.constant -5.000000e-01 : f32
      %132 = vector.broadcast %cst_49 : f32 to vector<16x128xf32>
      %133 = arith.subf %96, %132 : vector<16x128xf32>
      %134 = arith.mulf %133, %74 : vector<16x128xf32>
      %cst_50 = arith.constant 1.500000e+00 : f32
      %135 = vector.broadcast %cst_50 : f32 to vector<16x128xf32>
      %136 = arith.subf %135, %96 : vector<16x128xf32>
      %137 = arith.mulf %136, %78 : vector<16x128xf32>
      %138 = arith.addf %134, %137 : vector<16x128xf32>
      %cst_51 = arith.constant 5.000000e-01 : f32
      %139 = vector.broadcast %cst_51 : f32 to vector<16x128xf32>
      %140 = arith.subf %96, %139 : vector<16x128xf32>
      %141 = arith.mulf %140, %78 : vector<16x128xf32>
      %cst_52 = arith.constant 2.500000e+00 : f32
      %142 = vector.broadcast %cst_52 : f32 to vector<16x128xf32>
      %143 = arith.subf %142, %96 : vector<16x128xf32>
      %144 = arith.mulf %143, %82 : vector<16x128xf32>
      %145 = arith.addf %141, %144 : vector<16x128xf32>
      %cst_53 = arith.constant 1.500000e+00 : f32
      %146 = vector.broadcast %cst_53 : f32 to vector<16x128xf32>
      %147 = arith.subf %96, %146 : vector<16x128xf32>
      %148 = arith.mulf %147, %82 : vector<16x128xf32>
      %cst_54 = arith.constant 3.500000e+00 : f32
      %149 = vector.broadcast %cst_54 : f32 to vector<16x128xf32>
      %150 = arith.subf %149, %96 : vector<16x128xf32>
      %151 = arith.mulf %150, %86 : vector<16x128xf32>
      %152 = arith.addf %148, %151 : vector<16x128xf32>
      %cst_55 = arith.constant 2.500000e+00 : f32
      %153 = vector.broadcast %cst_55 : f32 to vector<16x128xf32>
      %154 = arith.subf %96, %153 : vector<16x128xf32>
      %155 = arith.mulf %154, %86 : vector<16x128xf32>
      %cst_56 = arith.constant 4.500000e+00 : f32
      %156 = vector.broadcast %cst_56 : f32 to vector<16x128xf32>
      %157 = arith.subf %156, %96 : vector<16x128xf32>
      %158 = arith.mulf %157, %90 : vector<16x128xf32>
      %159 = arith.addf %155, %158 : vector<16x128xf32>
      %cst_57 = arith.constant 3.500000e+00 : f32
      %160 = vector.broadcast %cst_57 : f32 to vector<16x128xf32>
      %161 = arith.subf %96, %160 : vector<16x128xf32>
      %162 = arith.mulf %161, %90 : vector<16x128xf32>
      %cst_58 = arith.constant 5.500000e+00 : f32
      %163 = vector.broadcast %cst_58 : f32 to vector<16x128xf32>
      %164 = arith.subf %163, %96 : vector<16x128xf32>
      %165 = arith.mulf %164, %94 : vector<16x128xf32>
      %166 = arith.addf %162, %165 : vector<16x128xf32>
      %cst_59 = arith.constant 1.250000e+00 : f32
      %167 = vector.broadcast %cst_59 : f32 to vector<16x128xf32>
      %168 = arith.mulf %10, %167 : vector<16x128xf32>
      %cst_60 = arith.constant -2.750000e+00 : f32
      %169 = vector.broadcast %cst_60 : f32 to vector<16x128xf32>
      %170 = arith.subf %168, %169 : vector<16x128xf32>
      %171 = arith.mulf %170, %103 : vector<16x128xf32>
      %cst_61 = arith.constant -1.250000e+00 : f32
      %172 = vector.broadcast %cst_61 : f32 to vector<16x128xf32>
      %173 = arith.subf %172, %168 : vector<16x128xf32>
      %174 = arith.mulf %173, %110 : vector<16x128xf32>
      %175 = arith.addf %171, %174 : vector<16x128xf32>
      %cst_62 = arith.constant -2.250000e+00 : f32
      %176 = vector.broadcast %cst_62 : f32 to vector<16x128xf32>
      %177 = arith.subf %168, %176 : vector<16x128xf32>
      %178 = arith.mulf %177, %110 : vector<16x128xf32>
      %cst_63 = arith.constant -7.500000e-01 : f32
      %179 = vector.broadcast %cst_63 : f32 to vector<16x128xf32>
      %180 = arith.subf %179, %168 : vector<16x128xf32>
      %181 = arith.mulf %180, %117 : vector<16x128xf32>
      %182 = arith.addf %178, %181 : vector<16x128xf32>
      %cst_64 = arith.constant -1.750000e+00 : f32
      %183 = vector.broadcast %cst_64 : f32 to vector<16x128xf32>
      %184 = arith.subf %168, %183 : vector<16x128xf32>
      %185 = arith.mulf %184, %117 : vector<16x128xf32>
      %cst_65 = arith.constant -2.500000e-01 : f32
      %186 = vector.broadcast %cst_65 : f32 to vector<16x128xf32>
      %187 = arith.subf %186, %168 : vector<16x128xf32>
      %188 = arith.mulf %187, %124 : vector<16x128xf32>
      %189 = arith.addf %185, %188 : vector<16x128xf32>
      %cst_66 = arith.constant -1.250000e+00 : f32
      %190 = vector.broadcast %cst_66 : f32 to vector<16x128xf32>
      %191 = arith.subf %168, %190 : vector<16x128xf32>
      %192 = arith.mulf %191, %124 : vector<16x128xf32>
      %cst_67 = arith.constant 2.500000e-01 : f32
      %193 = vector.broadcast %cst_67 : f32 to vector<16x128xf32>
      %194 = arith.subf %193, %168 : vector<16x128xf32>
      %195 = arith.mulf %194, %131 : vector<16x128xf32>
      %196 = arith.addf %192, %195 : vector<16x128xf32>
      %cst_68 = arith.constant -7.500000e-01 : f32
      %197 = vector.broadcast %cst_68 : f32 to vector<16x128xf32>
      %198 = arith.subf %168, %197 : vector<16x128xf32>
      %199 = arith.mulf %198, %131 : vector<16x128xf32>
      %cst_69 = arith.constant 7.500000e-01 : f32
      %200 = vector.broadcast %cst_69 : f32 to vector<16x128xf32>
      %201 = arith.subf %200, %168 : vector<16x128xf32>
      %202 = arith.mulf %201, %138 : vector<16x128xf32>
      %203 = arith.addf %199, %202 : vector<16x128xf32>
      %cst_70 = arith.constant -2.500000e-01 : f32
      %204 = vector.broadcast %cst_70 : f32 to vector<16x128xf32>
      %205 = arith.subf %168, %204 : vector<16x128xf32>
      %206 = arith.mulf %205, %138 : vector<16x128xf32>
      %cst_71 = arith.constant 1.250000e+00 : f32
      %207 = vector.broadcast %cst_71 : f32 to vector<16x128xf32>
      %208 = arith.subf %207, %168 : vector<16x128xf32>
      %209 = arith.mulf %208, %145 : vector<16x128xf32>
      %210 = arith.addf %206, %209 : vector<16x128xf32>
      %cst_72 = arith.constant 2.500000e-01 : f32
      %211 = vector.broadcast %cst_72 : f32 to vector<16x128xf32>
      %212 = arith.subf %168, %211 : vector<16x128xf32>
      %213 = arith.mulf %212, %145 : vector<16x128xf32>
      %cst_73 = arith.constant 1.750000e+00 : f32
      %214 = vector.broadcast %cst_73 : f32 to vector<16x128xf32>
      %215 = arith.subf %214, %168 : vector<16x128xf32>
      %216 = arith.mulf %215, %152 : vector<16x128xf32>
      %217 = arith.addf %213, %216 : vector<16x128xf32>
      %cst_74 = arith.constant 7.500000e-01 : f32
      %218 = vector.broadcast %cst_74 : f32 to vector<16x128xf32>
      %219 = arith.subf %168, %218 : vector<16x128xf32>
      %220 = arith.mulf %219, %152 : vector<16x128xf32>
      %cst_75 = arith.constant 2.250000e+00 : f32
      %221 = vector.broadcast %cst_75 : f32 to vector<16x128xf32>
      %222 = arith.subf %221, %168 : vector<16x128xf32>
      %223 = arith.mulf %222, %159 : vector<16x128xf32>
      %224 = arith.addf %220, %223 : vector<16x128xf32>
      %cst_76 = arith.constant 1.250000e+00 : f32
      %225 = vector.broadcast %cst_76 : f32 to vector<16x128xf32>
      %226 = arith.subf %168, %225 : vector<16x128xf32>
      %227 = arith.mulf %226, %159 : vector<16x128xf32>
      %cst_77 = arith.constant 2.750000e+00 : f32
      %228 = vector.broadcast %cst_77 : f32 to vector<16x128xf32>
      %229 = arith.subf %228, %168 : vector<16x128xf32>
      %230 = arith.mulf %229, %166 : vector<16x128xf32>
      %231 = arith.addf %227, %230 : vector<16x128xf32>
      %cst_78 = arith.constant 0.833333313 : f32
      %232 = vector.broadcast %cst_78 : f32 to vector<16x128xf32>
      %233 = arith.mulf %10, %232 : vector<16x128xf32>
      %cst_79 = arith.constant -1.83333337 : f32
      %234 = vector.broadcast %cst_79 : f32 to vector<16x128xf32>
      %235 = arith.subf %233, %234 : vector<16x128xf32>
      %236 = arith.mulf %235, %175 : vector<16x128xf32>
      %cst_80 = arith.constant -5.000000e-01 : f32
      %237 = vector.broadcast %cst_80 : f32 to vector<16x128xf32>
      %238 = arith.subf %237, %233 : vector<16x128xf32>
      %239 = arith.mulf %238, %182 : vector<16x128xf32>
      %240 = arith.addf %236, %239 : vector<16x128xf32>
      %cst_81 = arith.constant -1.500000e+00 : f32
      %241 = vector.broadcast %cst_81 : f32 to vector<16x128xf32>
      %242 = arith.subf %233, %241 : vector<16x128xf32>
      %243 = arith.mulf %242, %182 : vector<16x128xf32>
      %cst_82 = arith.constant -0.166666672 : f32
      %244 = vector.broadcast %cst_82 : f32 to vector<16x128xf32>
      %245 = arith.subf %244, %233 : vector<16x128xf32>
      %246 = arith.mulf %245, %189 : vector<16x128xf32>
      %247 = arith.addf %243, %246 : vector<16x128xf32>
      %cst_83 = arith.constant -1.16666663 : f32
      %248 = vector.broadcast %cst_83 : f32 to vector<16x128xf32>
      %249 = arith.subf %233, %248 : vector<16x128xf32>
      %250 = arith.mulf %249, %189 : vector<16x128xf32>
      %cst_84 = arith.constant 0.166666672 : f32
      %251 = vector.broadcast %cst_84 : f32 to vector<16x128xf32>
      %252 = arith.subf %251, %233 : vector<16x128xf32>
      %253 = arith.mulf %252, %196 : vector<16x128xf32>
      %254 = arith.addf %250, %253 : vector<16x128xf32>
      %cst_85 = arith.constant -0.833333313 : f32
      %255 = vector.broadcast %cst_85 : f32 to vector<16x128xf32>
      %256 = arith.subf %233, %255 : vector<16x128xf32>
      %257 = arith.mulf %256, %196 : vector<16x128xf32>
      %cst_86 = arith.constant 5.000000e-01 : f32
      %258 = vector.broadcast %cst_86 : f32 to vector<16x128xf32>
      %259 = arith.subf %258, %233 : vector<16x128xf32>
      %260 = arith.mulf %259, %203 : vector<16x128xf32>
      %261 = arith.addf %257, %260 : vector<16x128xf32>
      %cst_87 = arith.constant -5.000000e-01 : f32
      %262 = vector.broadcast %cst_87 : f32 to vector<16x128xf32>
      %263 = arith.subf %233, %262 : vector<16x128xf32>
      %264 = arith.mulf %263, %203 : vector<16x128xf32>
      %cst_88 = arith.constant 0.833333313 : f32
      %265 = vector.broadcast %cst_88 : f32 to vector<16x128xf32>
      %266 = arith.subf %265, %233 : vector<16x128xf32>
      %267 = arith.mulf %266, %210 : vector<16x128xf32>
      %268 = arith.addf %264, %267 : vector<16x128xf32>
      %cst_89 = arith.constant -0.166666672 : f32
      %269 = vector.broadcast %cst_89 : f32 to vector<16x128xf32>
      %270 = arith.subf %233, %269 : vector<16x128xf32>
      %271 = arith.mulf %270, %210 : vector<16x128xf32>
      %cst_90 = arith.constant 1.16666663 : f32
      %272 = vector.broadcast %cst_90 : f32 to vector<16x128xf32>
      %273 = arith.subf %272, %233 : vector<16x128xf32>
      %274 = arith.mulf %273, %217 : vector<16x128xf32>
      %275 = arith.addf %271, %274 : vector<16x128xf32>
      %cst_91 = arith.constant 0.166666672 : f32
      %276 = vector.broadcast %cst_91 : f32 to vector<16x128xf32>
      %277 = arith.subf %233, %276 : vector<16x128xf32>
      %278 = arith.mulf %277, %217 : vector<16x128xf32>
      %cst_92 = arith.constant 1.500000e+00 : f32
      %279 = vector.broadcast %cst_92 : f32 to vector<16x128xf32>
      %280 = arith.subf %279, %233 : vector<16x128xf32>
      %281 = arith.mulf %280, %224 : vector<16x128xf32>
      %282 = arith.addf %278, %281 : vector<16x128xf32>
      %cst_93 = arith.constant 5.000000e-01 : f32
      %283 = vector.broadcast %cst_93 : f32 to vector<16x128xf32>
      %284 = arith.subf %233, %283 : vector<16x128xf32>
      %285 = arith.mulf %284, %224 : vector<16x128xf32>
      %cst_94 = arith.constant 1.83333337 : f32
      %286 = vector.broadcast %cst_94 : f32 to vector<16x128xf32>
      %287 = arith.subf %286, %233 : vector<16x128xf32>
      %288 = arith.mulf %287, %231 : vector<16x128xf32>
      %289 = arith.addf %285, %288 : vector<16x128xf32>
      %290 = vector.extract_strided_slice %240 {offsets = [0, 0], sizes = [16, 16], strides = [1, 1]} : vector<16x128xf32> to vector<16x16xf32>
      %c0_95 = arith.constant 0 : index
      %c0_96 = arith.constant 0 : index
      %291 = vector.load %arg12[%c0_95, %c0_96] : memref<16x128xf32, #tpu.memory_space<vmem>>, vector<16x16xf32>
      tpu.vector_store %arg12[%c0_95, %c0_96], %290 {strides = array<i32>} : memref<16x128xf32, #tpu.memory_space<vmem>>, vector<16x16xf32>,
      %292 = vector.extract_strided_slice %247 {offsets = [0, 0], sizes = [16, 16], strides = [1, 1]} : vector<16x128xf32> to vector<16x16xf32>
      %c0_97 = arith.constant 0 : index
      %c16 = arith.constant 16 : index
      %293 = vector.load %arg12[%c0_97, %c16] : memref<16x128xf32, #tpu.memory_space<vmem>>, vector<16x16xf32>
      tpu.vector_store %arg12[%c0_97, %c16], %292 {strides = array<i32>} : memref<16x128xf32, #tpu.memory_space<vmem>>, vector<16x16xf32>,
      %294 = vector.extract_strided_slice %254 {offsets = [0, 0], sizes = [16, 16], strides = [1, 1]} : vector<16x128xf32> to vector<16x16xf32>
      %c0_98 = arith.constant 0 : index
      %c32 = arith.constant 32 : index
      %295 = vector.load %arg12[%c0_98, %c32] : memref<16x128xf32, #tpu.memory_space<vmem>>, vector<16x16xf32>
      tpu.vector_store %arg12[%c0_98, %c32], %294 {strides = array<i32>} : memref<16x128xf32, #tpu.memory_space<vmem>>, vector<16x16xf32>,
      %296 = vector.extract_strided_slice %261 {offsets = [0, 0], sizes = [16, 16], strides = [1, 1]} : vector<16x128xf32> to vector<16x16xf32>
      %c0_99 = arith.constant 0 : index
      %c48 = arith.constant 48 : index
      %297 = vector.load %arg12[%c0_99, %c48] : memref<16x128xf32, #tpu.memory_space<vmem>>, vector<16x16xf32>
      tpu.vector_store %arg12[%c0_99, %c48], %296 {strides = array<i32>} : memref<16x128xf32, #tpu.memory_space<vmem>>, vector<16x16xf32>,
      %298 = vector.extract_strided_slice %268 {offsets = [0, 0], sizes = [16, 16], strides = [1, 1]} : vector<16x128xf32> to vector<16x16xf32>
      %c0_100 = arith.constant 0 : index
      %c64 = arith.constant 64 : index
      %299 = vector.load %arg12[%c0_100, %c64] : memref<16x128xf32, #tpu.memory_space<vmem>>, vector<16x16xf32>
      tpu.vector_store %arg12[%c0_100, %c64], %298 {strides = array<i32>} : memref<16x128xf32, #tpu.memory_space<vmem>>, vector<16x16xf32>,
      %300 = vector.extract_strided_slice %275 {offsets = [0, 0], sizes = [16, 16], strides = [1, 1]} : vector<16x128xf32> to vector<16x16xf32>
      %c0_101 = arith.constant 0 : index
      %c80 = arith.constant 80 : index
      %301 = vector.load %arg12[%c0_101, %c80] : memref<16x128xf32, #tpu.memory_space<vmem>>, vector<16x16xf32>
      tpu.vector_store %arg12[%c0_101, %c80], %300 {strides = array<i32>} : memref<16x128xf32, #tpu.memory_space<vmem>>, vector<16x16xf32>,
      %302 = vector.extract_strided_slice %282 {offsets = [0, 0], sizes = [16, 16], strides = [1, 1]} : vector<16x128xf32> to vector<16x16xf32>
      %c0_102 = arith.constant 0 : index
      %c96 = arith.constant 96 : index
      %303 = vector.load %arg12[%c0_102, %c96] : memref<16x128xf32, #tpu.memory_space<vmem>>, vector<16x16xf32>
      tpu.vector_store %arg12[%c0_102, %c96], %302 {strides = array<i32>} : memref<16x128xf32, #tpu.memory_space<vmem>>, vector<16x16xf32>,
      %304 = vector.extract_strided_slice %289 {offsets = [0, 0], sizes = [16, 16], strides = [1, 1]} : vector<16x128xf32> to vector<16x16xf32>
      %c0_103 = arith.constant 0 : index
      %c112 = arith.constant 112 : index
      %305 = vector.load %arg12[%c0_103, %c112] : memref<16x128xf32, #tpu.memory_space<vmem>>, vector<16x16xf32>
      tpu.vector_store %arg12[%c0_103, %c112], %304 {strides = array<i32>} : memref<16x128xf32, #tpu.memory_space<vmem>>, vector<16x16xf32>,
      %c0_104 = arith.constant 0 : index
      %c0_105 = arith.constant 0 : index
      %306 = vector.load %arg12[%c0_104, %c0_105] : memref<16x128xf32, #tpu.memory_space<vmem>>, vector<16x128xf32>
      %c0_106 = arith.constant 0 : index
      %c0_107 = arith.constant 0 : index
      %307 = vector.load %arg7[%c0_106, %c0_107] : memref<128x128xf32, #tpu.memory_space<vmem>>, vector<128x128xf32>
      %cst_108 = arith.constant dense<0.000000e+00> : vector<16x128xf32>
      %308 = tpu.matmul %306, %307, %cst_108 {dimension_numbers = #tpu.dot_dimension_numbers<[1], [0], [0], [1], [0, 0, 1, 1], [], []>} : vector<16x128xf32>, vector<128x128xf32>, vector<16x128xf32> -> vector<16x128xf32>
      %309 = arith.addf %26, %308 : vector<16x128xf32>
      %c0_109 = arith.constant 0 : index
      %c0_110 = arith.constant 0 : index
      %310 = vector.load %arg8[%c0_109, %c0_110] : memref<16x128xf32, #tpu.memory_space<vmem>>, vector<16x128xf32>
      tpu.vector_store %arg8[%c0_109, %c0_110], %309 {strides = array<i32>} : memref<16x128xf32, #tpu.memory_space<vmem>>, vector<16x128xf32>,
    } else {
    }
    return
  }
  func.func @transform_0(%arg0: i32, %arg1: i32) -> (i32, i32) {
    %c0_i32 = arith.constant 0 : i32
    %c0_i32_0 = arith.constant 0 : i32
    %c0_i32_1 = arith.constant 0 : i32
    return %c0_i32, %c0_i32_0 : i32, i32
  }
  func.func @transform_1(%arg0: i32, %arg1: i32) -> (i32, i32) {
    %c0_i32 = arith.constant 0 : i32
    %c0_i32_0 = arith.constant 0 : i32
    return %arg1, %c0_i32 : i32, i32
  }
  func.func @transform_2(%arg0: i32, %arg1: i32) -> (i32, i32, i32) {
    %c0_i32 = arith.constant 0 : i32
    %c0_i32_0 = arith.constant 0 : i32
    %c0_i32_1 = arith.constant 0 : i32
    return %arg0, %c0_i32, %c0_i32_0 : i32, i32, i32
  }
  func.func @transform_3(%arg0: i32, %arg1: i32) -> (i32, i32, i32) {
    %c0_i32 = arith.constant 0 : i32
    %c0_i32_0 = arith.constant 0 : i32
    %c0_i32_1 = arith.constant 0 : i32
    return %arg0, %c0_i32, %c0_i32_0 : i32, i32, i32
  }
  func.func @transform_4(%arg0: i32, %arg1: i32) -> (i32, i32) {
    %c0_i32 = arith.constant 0 : i32
    %c0_i32_0 = arith.constant 0 : i32
    %c0_i32_1 = arith.constant 0 : i32
    return %c0_i32, %c0_i32_0 : i32, i32
  }
  func.func @transform_5(%arg0: i32, %arg1: i32) -> (i32, i32) {
    %c0_i32 = arith.constant 0 : i32
    %c0_i32_0 = arith.constant 0 : i32
    %c0_i32_1 = arith.constant 0 : i32
    return %c0_i32, %c0_i32_0 : i32, i32
  }
  func.func @transform_6(%arg0: i32, %arg1: i32) -> (i32, i32) {
    %c0_i32 = arith.constant 0 : i32
    %c0_i32_0 = arith.constant 0 : i32
    return %arg1, %c0_i32 : i32, i32
  }
  func.func @transform_7(%arg0: i32, %arg1: i32) -> (i32, i32) {
    %c0_i32 = arith.constant 0 : i32
    %c0_i32_0 = arith.constant 0 : i32
    return %arg1, %c0_i32 : i32, i32
  }
}

</mosaic_0001>

<bundles_post_ra>
// kernel: tpu_custom_call.1
= control target key start
LH: loop header
LB: loop body
LE: loop exit
PB: predicated region body
PF: predicated region fallthrough
CT: control target
= control target key end

     0   :  { %13 = vsyncpa [#allocation6], 0  ;;  %s2724_s0 = inlined_call_operand.hbm [shape: f32[16,128], index: 0, kind: input, shape index: {}]   ;;  %s2725_s1 = inlined_call_operand.hbm [shape: f32[16,16], index: 1, kind: input, shape index: {}]   ;;  %s2726_s2 = inlined_call_operand.hbm [shape: f32[3,128,128], index: 2, kind: input, shape index: {}]   ;;  %s2727_s3 = inlined_call_operand.vmem [shape: f32[3,1,128], index: 3, kind: input, shape index: {}]   ;;  %s2728_s4 = inlined_call_operand.hbm [shape: f32[128,128], index: 4, kind: input, shape index: {}]   ;;  %s2729_s5 = inlined_call_operand.hbm [shape: f32[128,128], index: 5, kind: input, shape index: {}]   ;;  %s2730_s6 = inlined_call_operand.hbm [shape: f32[16,128], index: 6, kind: output, shape index: {0}]   ;;  %s2731_s7 = inlined_call_operand.hbm [shape: f32[16,128], index: 7, kind: output, shape index: {1}]  }
   0x1   :  { %14 = vsyncpa [#allocation9], 0 }
   0x2   :  { %15 = vsyncpa [#allocation13], 0 }
   0x3   :  { %16 = vsyncpa [#allocation7], 0 }
   0x4   :  { %17 = vsyncpa [#allocation16], 0  ;;  %s2142_s24 = smov 0   ;;  %s2144_s25 = smov 0  }
   0x5   :  { %s2146_s26 = smov 0   ;;  %s2148_s27 = smov 0  }
   0x6   :  { %s2150_s28 = smov 0   ;;  %s2152_s29 = smov 0  }
   0x7 LB: > { %s2171_s30 = sadd.s32 4294967295, %s2080_s29   ;;  %p102_p0 = scmp.ne.s32.totalorder %s2064_s25, %s2060_s24  ;;  %s2080_s29 = sphi %s2152_s29, %s23_s29   ;;  %s2076_s28 = sphi %s2150_s28, %s2750_s28   ;;  %s2072_s27 = sphi %s2148_s27, %s2749_s27   ;;  %s2068_s26 = sphi %s2146_s26, %s2748_s26   ;;  %s2064_s25 = sphi %s2144_s25, %s2747_s25   ;;  %s2060_s24 = sphi %s2142_s24, %s2746_s24  }
   0x8   : > { %p103_p1 = scmp.eq.s32.totalorder %s2171_s30, 0  ;;  %p1419_p2 = scmp.ge.s32.totalorder %s2080_s29, 1 }
   0x9   : > { %p233_p3 = scmp.lt.s32.totalorder %s2080_s29, 4  ;;  %s2082_s10 = smov [#allocation5]  }
   0xa   : > { %p2179_p4 = por %p103_p1, %p102_p0  ;;  %s245_s11 = sshll.u32 %s2082_s10, 4  ;;  %s246_s11 = int_to_ptr.vmem [resolvable:$true] %s245_s11 }
   0xb   : > { %p2183_p5 = pnand %p1419_p2, %p233_p3  ;;  %s2083_s13 = smov [#allocation8]  }
   0xc   : > { %s261_s14 = sshll.u32 %s2083_s13, 4  ;;  %s2084_s15 = smov [#allocation11]   ;;  %s262_s14 = int_to_ptr.vmem [resolvable:$true] %s261_s14 }
   0xd   : > { %p1721_p6 = pneg %p2183_p5  ;;  %s274_s16 = sshll.u32 %s2084_s15, 4  ;;  %s275_s16 = int_to_ptr.vmem [resolvable:$true] %s274_s16 }
   0xe   : > { %s1837_s17 = scalar_lea.vmem %s246_s11, 256  ;;  %p1845_p12 = scmp.lt.s32.totalorder %s246_s11, %s246_s11 }
   0xf   : > { %p2191_p7 = pnand %p1721_p6, %p103_p1  ;;  %p1838_p9 = scmp.ne.s32.totalorder %s246_s11, %s1837_s17 }
  0x10   : > { %p1846_p13 = scmp.lt.s32.totalorder %s1837_s17, %s1837_s17 }
  0x11   : > { %p1828_p8 = pneg %p2191_p7 }
  0x12   : > { %p1847_p0 = por %p1846_p13, %p1845_p12 }
  0x13   : > { %p1840_p10 = pnand %p1838_p9, %p1828_p8 }
  0x15   : > { %p1841_p11 = pneg %p1840_p10 }
  0x17   : > { %p1848_p2 = pnand %p1847_p0, %p1841_p11 }
  0x19   : > { %1851 = shalt.err (!%p1848_p2)
}
  0x1a   : > { %s2732_s18 = smov 128   ;;  %s2733_s19 = smov 8  }
  0x1b   : > { %1724 = dma.hbm_to_vmem [thread:$0]  (!%p2191_p7), %s2724_s0, 256, %s246_s11, [#allocation6], %s2732_s18, %s2732_s18, %s2733_s19  }
  0x1c   : > { %s1863_s22 = scalar_lea.vmem %s262_s14, 256  ;;  %p1871_p10 = scmp.lt.s32.totalorder %s262_s14, %s262_s14 }
  0x1d   : > { %p1864_p3 = scmp.ne.s32.totalorder %s262_s14, %s1863_s22  ;;  %p1872_p11 = scmp.lt.s32.totalorder %s1863_s22, %s1863_s22 }
  0x1f   : > { %p1866_p6 = pnand %p1864_p3, %p1828_p8  ;;  %p1873_p12 = por %p1872_p11, %p1871_p10 }
  0x21   : > { %p1867_p9 = pneg %p1866_p6 }
  0x23   : > { %p1874_p13 = pnand %p1873_p12, %p1867_p9 }
  0x25   : > { %1877 = shalt.err (!%p1874_p13)
}
  0x26   : > { %1727 = dma.hbm_to_vmem [thread:$0]  (!%p2191_p7), %s2725_s1, 256, %s262_s14, [#allocation9], %s2732_s18, %s2732_s18, %s2733_s19  }
  0x27   : > { %s1889_s10 = scalar_lea.vmem %s275_s16, 2048  ;;  %p1897_p6 = scmp.lt.s32.totalorder %s275_s16, %s275_s16 }
  0x28   : > { %p1890_p0 = scmp.ne.s32.totalorder %s275_s16, %s1889_s10  ;;  %p1898_p9 = scmp.lt.s32.totalorder %s1889_s10, %s1889_s10 }
  0x2a   : > { %p1892_p2 = pnand %p1890_p0, %p1828_p8  ;;  %p1899_p10 = por %p1898_p9, %p1897_p6 }
  0x2c   : > { %p1893_p3 = pneg %p1892_p2 }
  0x2e   : > { %p1900_p11 = pnand %p1899_p10, %p1893_p3 }
  0x30   : > { %1903 = shalt.err (!%p1900_p11)
}
  0x31   : > { %1730 = dma.hbm_to_vmem [thread:$0]  (!%p2191_p7), %s2728_s4, 2048, %s275_s16, [#allocation9], %s2732_s18, %s2732_s18, %s2733_s19  }
  0x32   : > { %s2087_s14 = smov [#allocation12]  }
  0x33   : > { %s287_s15 = sshll.u32 %s2087_s14, 4  ;;  %s288_s15 = int_to_ptr.vmem [resolvable:$true] %s287_s15 }
  0x34   : > { %s1915_s17 = scalar_lea.vmem %s288_s15, 2048  ;;  %p1923_p2 = scmp.lt.s32.totalorder %s288_s15, %s288_s15 }
  0x35   : > { %p1916_p12 = scmp.ne.s32.totalorder %s288_s15, %s1915_s17  ;;  %p1924_p3 = scmp.lt.s32.totalorder %s1915_s17, %s1915_s17 }
  0x37   : > { %p1918_p13 = pnand %p1916_p12, %p1828_p8  ;;  %p1925_p6 = por %p1924_p3, %p1923_p2 }
  0x39   : > { %p1919_p0 = pneg %p1918_p13 }
  0x3b   : > { %p1926_p9 = pnand %p1925_p6, %p1919_p0 }
  0x3d   : > { %1929 = shalt.err (!%p1926_p9)
}
  0x3e   : > { %1733 = dma.hbm_to_vmem [thread:$0]  (!%p2191_p7), %s2729_s5, 2048, %s288_s15, [#allocation13], %s2732_s18, %s2732_s18, %s2733_s19  }
  0x3f   : > { %s35_s21 = sadd.s32 1, %s2076_s28  ;;  %s89_s12 = sadd.s32 1, %s2068_s26 }
  0x40   : > { %p37_p8 = scmp.ge.s32.totalorder %s35_s21, 3  ;;  %p96_p10 = scmp.ne.s32.totalorder %s2068_s26, %s2064_s25 }
  0x41   : > { %p97_p11 = scmp.eq.s32.totalorder %s2080_s29, 0  ;;  %p1742_p12 = scmp.lt.s32.totalorder %s2080_s29, 3 }
  0x42   : > { %s2752_s21 = smov (%p37_p8, %s35_s21), 0  ;;  %s301_s22 = sand.u32 1, %s2080_s29  }
  0x43   : > { %p98_p13 = por %p97_p11, %p96_p10  ;;  %s86_s23 = ssub.s32 %s2076_s28, %s2752_s21 }
  0x44   : > { %p87_p0 = scmp.eq.s32.totalorder %s86_s23, 0  ;;  %s303_s24 = sand.u32 1, %s2068_s26  }
  0x45   : > { %s1425_s10 = sshll.u32 %s303_s24, 7  ;;  %s1523_s11 = sshll.u32 %s2076_s28, 11 }
  0x46   : > { %s2255_s13 = scalar_select %p87_p0, %s2068_s26, %s89_s12  }
  0x47   : > { %s311_s17 = scalar_lea.hbm %s2726_s2, %s1523_s11  ;;  %s305_s16 = scalar_lea.vmem [#allocation10], %s1425_s10 }
  0x48   : > { %s312_s20 = sshll.u32 %s305_s16, 4  ;;  %p2262_p7 = pnand %p1742_p12, %p98_p13  ;;  %s313_s20 = int_to_ptr.vmem [resolvable:$true] %s312_s20 }
  0x49   : > { %s302_s19 = scalar_lea.sflag [#allocation6], %s301_s22  ;;  %s1943_s23 = scalar_lea.vmem %s313_s20, 2048 }
  0x4a   : > { %p1932_p2 = pneg %p2262_p7  ;;  %p1944_p3 = scmp.ne.s32.totalorder %s313_s20, %s1943_s23 }
  0x4b   : > { %s2088_s12 = smov [#allocation10]  }
  0x4c   : > { %p1946_p6 = pnand %p1944_p3, %p1932_p2  ;;  %s1948_s24 = sshll.u32 %s2088_s12, 4  ;;  %s1949_s24 = int_to_ptr.vmem [resolvable:$false] %s1948_s24 }
  0x4d   : > { %s1950_s11 = scalar_lea.vmem %s1949_s24, 4096  ;;  %p1951_p8 = scmp.lt.s32.totalorder %s313_s20, %s1949_s24 }
  0x4e   : > { %p1947_p9 = pneg %p1946_p6  ;;  %p1952_p10 = scmp.lt.s32.totalorder %s1950_s11, %s1943_s23 }
  0x50   : > { %p1953_p11 = por %p1952_p10, %p1951_p8 }
  0x52   : > { %p1954_p12 = pnand %p1953_p11, %p1947_p9 }
  0x54   : > { %1957 = shalt.err (!%p1954_p12)
}
  0x55   : > { %s2738_s10 = smov 8   ;;  %s2739_s14 = smov 128  }
  0x56   : > { %1737 = dma.hbm_to_vmem [thread:$0]  (!%p2262_p7), %s311_s17, 2048, %s313_s20, %s302_s19, %s2739_s14, %s2739_s14, %s2738_s10  }
  0x57   : > { %330 = sbr.rel (%p2183_p5) target bundleno = 972 (0x3cc), region = 44 }
  0x5c   : > { %2031 = dma.done.wait (%p103_p1), [#allocation6], 256  }
  0x5d   : > { %2033 = vsyncadd (%p103_p1), [#allocation6], 4294967040 }
  0x5e   : > { %2035 = dma.done.wait (%p103_p1), [#allocation9], 256  }
  0x5f   : > { %2037 = vsyncadd (%p103_p1), [#allocation9], 4294967040  ;;  %s340_s18 = sand.u32 1, %s2171_s30   ;;  %s342_s19 = sand.u32 1, %s2064_s25  }
  0x60   : > { %s1431_s22 = sshll.u32 %s342_s19, 7  ;;  %s341_s9 = scalar_lea.sflag [#allocation6], %s340_s18 }
  0x61   : > { %s2285_s15 = scalar_lea.vmem [#allocation10], %s1431_s22 }
  0x62   : > { %2039 = dma.done.wait (%p2179_p4), %s341_s9, 2048  }
  0x63   : > { %2041 = vsyncadd (%p2179_p4), %s341_s9, 4294965248 }
  0x64   : > { %2043 = dma.done.wait (%p103_p1), [#allocation9], 2048  }
  0x65   : > { %2045 = vsyncadd (%p103_p1), [#allocation9], 4294965248 }
  0x66   : > { %2047 = dma.done.wait (%p103_p1), [#allocation13], 2048  }
  0x67   : > { %2049 = vsyncadd (%p103_p1), [#allocation13], 4294965248  ;;  %p382_p5 = scmp.lt.s32.totalorder %s2072_s27, 2  ;;  %p387_p13 = scmp.eq.s32.totalorder %s2072_s27, 0 }
  0x68   : > { %v393_v0 = vld [vmem:[#allocation5] sm:$0xff] (%p387_p13)  ;;  %v394_v1 = vld [vmem:[#allocation5 + $0x8] sm:$0xff] (%p387_p13) }
  0x69   : > { %s2302_s17 = scalar_select %p382_p5, %s2072_s27, 2  ;;  %395 = vst [vmem:[#allocation2] sm:$0xff] (%p387_p13), %v393_v0  ;;  %396 = vst [vmem:[#allocation2 + $0x8] sm:$0xff] (%p387_p13), %v394_v1 }
  0x6a   : > { %392 = sbr.rel (!%p387_p13) target bundleno = 111 (0x6f), region = 68 }
  0x6b   : > { %s384_s20 = scalar_lea.vmem %s2727_s3, %s2302_s17 }
  0x6f PF: > { %v417_v2 = vld [vmem:[%s2285_s15 + $0x78] sm:$0xff]  ;;  %v416_v3 = vld [vmem:[%s2285_s15 + $0x70] sm:$0xff]  ;;  %v415_v4 = vld [vmem:[%s2285_s15 + $0x68] sm:$0xff]  ;;  %vm506_vm0 = vcmask 130048   ;;  %p1438_p1 = scmp.ne.s32.totalorder %s2072_s27, 2 }
  0x70   : > { %1583 = vmatprep.subr.mxu0 %v417_v2  ;;  %v414_v5 = vld [vmem:[%s2285_s15 + $0x60] sm:$0xff]  ;;  %v413_v7 = vld [vmem:[%s2285_s15 + $0x58] sm:$0xff]  ;;  %v412_v8 = vld [vmem:[%s2285_s15 + $0x50] sm:$0xff]  ;;  %s2091_s27 = smov (!%p1438_p1), 16   ;;  %s2092_s24 = smov (!%p1438_p1), 32  }
  0x71   : > { %1584 = vmatpush3.msra.mxu0 %v417_v2  ;;  %v400_v6 = vld [vmem:[#allocation2] sm:$0xff]  ;;  %v411_v9 = vld [vmem:[%s2285_s15 + $0x48] sm:$0xff]  ;;  %v409_v11 = vld [vmem:[%s2285_s15 + $0x38] sm:$0xff]  ;;  %s2093_s11 = smov (!%p1438_p1), 48   ;;  %s2094_s10 = smov (!%p1438_p1), 64  }
  0x72   : > { %1585 = vmatprep.subr.mxu0 %v416_v3  ;;  %1615 = vmatprep.mubr.f32.mxu0 %v400_v6  ;;  %v410_v10 = vld [vmem:[%s2285_s15 + $0x40] sm:$0xff]  ;;  %v408_v12 = vld [vmem:[%s2285_s15 + $0x30] sm:$0xff]  ;;  %v407_v13 = vld [vmem:[%s2285_s15 + $0x28] sm:$0xff]  ;;  %s2095_s14 = smov (!%p1438_p1), 80   ;;  %s2096_s18 = smov (!%p1438_p1), 96  }
  0x73   : > { %1586 = vmatpush3.msra.mxu0 %v416_v3  ;;  %v406_v14 = vld [vmem:[%s2285_s15 + $0x20] sm:$0xff]  ;;  %v405_v15 = vld [vmem:[%s2285_s15 + $0x18] sm:$0xff]  ;;  %v404_v16 = vld [vmem:[%s2285_s15 + $0x10] sm:$0xff]  ;;  %s2097_s19 = smov (!%p1438_p1), 112  }
  0x74   : > { %1587 = vmatprep.subr.mxu0 %v415_v4  ;;  %v403_v17 = vld [vmem:[%s2285_s15 + $0x8] sm:$0xff]  ;;  %v402_v18 = vld [vmem:[%s2285_s15] sm:$0xff]  ;;  %v502_v20 = vld [vmem:[#allocation8] sm:$0xff] }
  0x75   : > { %1588 = vmatpush3.msra.mxu0 %v415_v4  ;;  %v401_v19 = vld [vmem:[#allocation2 + $0x8] sm:$0xff]  ;;  %1622 = vmatprep.mubr.msk.f32.mxu1 %vm506_vm0, %v502_v20  ;;  %v1435_v21 = vld [vmem:[%s384_s20] ss:$0 sm:$0xff]  ;;  %v503_v26 = vld [vmem:[#allocation8 + $0x8] sm:$0xff] }
  0x76   : > { %1589 = vmatprep.subr.mxu0 %v414_v5 }
  0x77   : > { %1590 = vmatpush3.msra.mxu0 %v414_v5 }
  0x78   : > { %1591 = vmatprep.subr.mxu0 %v413_v7 }
  0x79   : > { %1592 = vmatpush3.msra.mxu0 %v413_v7 }
  0x7a   : > { %1593 = vmatprep.subr.mxu0 %v412_v8 }
  0x7b   : > { %1594 = vmatpush3.msra.mxu0 %v412_v8 }
  0x7c   : > { %1595 = vmatprep.subr.mxu0 %v411_v9 }
  0x7d   : > { %1596 = vmatpush3.msra.mxu0 %v411_v9 }
  0x7e   : > { %1597 = vmatprep.subr.mxu0 %v410_v10 }
  0x7f   : > { %1598 = vmatpush3.msra.mxu0 %v410_v10 }
  0x80   : > { %1599 = vmatprep.subr.mxu0 %v409_v11 }
  0x81   : > { %1600 = vmatpush3.msra.mxu0 %v409_v11 }
  0x82   : > { %1601 = vmatprep.subr.mxu0 %v408_v12 }
  0x83   : > { %1602 = vmatpush3.msra.mxu0 %v408_v12 }
  0x84   : > { %1603 = vmatprep.subr.mxu0 %v407_v13 }
  0x85   : > { %1604 = vmatpush3.msra.mxu0 %v407_v13 }
  0x86   : > { %1605 = vmatprep.subr.mxu0 %v406_v14 }
  0x87   : > { %1606 = vmatpush3.msra.mxu0 %v406_v14 }
  0x88   : > { %1607 = vmatprep.subr.mxu0 %v405_v15 }
  0x89   : > { %1608 = vmatpush3.msra.mxu0 %v405_v15 }
  0x8a   : > { %1609 = vmatprep.subr.mxu0 %v404_v16 }
  0x8b   : > { %1610 = vmatpush3.msra.mxu0 %v404_v16 }
  0x8c   : > { %1611 = vmatprep.subr.mxu0 %v403_v17 }
  0x8d   : > { %1612 = vmatpush3.msra.mxu0 %v403_v17 }
  0x8e   : > { %1613 = vmatprep.subr.mxu0 %v402_v18 }
  0x8f   : > { %1614 = vmatpush3.msra.mxu0 %v402_v18 }
  0x90   : > { %1616 = vmatmul.mubr.f32.vlgmr.msra.gmra.mxu0 %v401_v19 }
 0x150   : > { %v1617_v22 = vpop.f32.mrf.mxu0 }
 0x151   : > { %v497_v23 = vadd.f32 %v1617_v22, %v1435_v21 }
 0x152   : > { %v491_v24 = vpop.f32.mrf.mxu0 }
 0x153   : > { %v492_v25 = vadd.f32 %v1435_v21, %v491_v24  ;;  %1618 = vmatprep.subr.mxu1 %v497_v23 }
 0x154   : > { %1619 = vmatpush3.msra.mxu1 %v497_v23 }
 0x155   : > { %1620 = vmatprep.subr.mxu1 %v492_v25 }
 0x156   : > { %1621 = vmatpush3.msra.mxu1 %v492_v25 }
 0x157   : > { %1623 = vmatmul.mubr.msk.f32.vlgmr.msra.gmra.mxu1 %vm506_vm0, %v503_v26 }
 0x216   : > { %595 = sbr.rel (%p1438_p1) target bundleno = 941 (0x3ad), region = 76 }
 0x217   : > { %v2331_v27 = vpop.f32.mrf.mxu1 }
 0x218   : > { %591 = vst [vmem:[#allocation2 + $0x8] sm:$0xff] %v2331_v27 }
 0x219   : > { %v2334_v28 = vpop.f32.mrf.mxu1 }
 0x21a   : > { %590 = vst [vmem:[#allocation2] sm:$0xff] %v2334_v28 }
 0x21b   : > { %vm630_vm1 = vcmp.ge.f32.partialorder %v2334_v28, -1.8  ;;  %vm632_vm2 = vcmp.ge.f32.partialorder %v2334_v28, -1.4  ;;  %vm634_vm3 = vcmp.ge.f32.partialorder %v2334_v28, -1.0  ;;  %596 = vst [vmem:[#allocation15] sm:$0xff] %v2334_v28 }
 0x21c   : > { %597 = vst [vmem:[#allocation15 + $0x8] sm:$0xff] %v2331_v27  ;;  %vm2089_vm4 = vmmov 1   ;;  %v2347_v29 = vmul.f32 2.5, %v2334_v28  ;;  %vm636_vm6 = vcmp.ge.f32.partialorder %v2334_v28, -0.6  ;;  %v2353_v30 = vmul.f32 1.25, %v2334_v28 }
 0x21d   : > { %vm660_vm5 = vmxor %vm632_vm2, %vm2089_vm4  ;;  %v2090_v31 = vmov 0.0   ;;  %v2364_v35 = vmul.f32 0.8333333, %v2334_v28  ;;  %vm638_vm9 = vcmp.ge.f32.partialorder %v2334_v28, -0.2  ;;  %v627_v58 = vld [vmem:[#allocation11 + $0x78] sm:$0xff] }
 0x21e   : > { %vm662_vm7 = vmand %vm630_vm1, %vm660_vm5  ;;  %v1465_v33 = vadd.f32 4.5, %v2347_v29  ;;  %v756_v34 = vsub.f32 -2.5, %v2347_v29  ;;  %v1467_v36 = vadd.f32 3.5, %v2347_v29  ;;  %v766_v37 = vsub.f32 -1.5, %v2347_v29  ;;  %1660 = vmatprep.subr.mxu1 %v627_v58  ;;  %v1112_v6 = vld [vmem:[#allocation12 + $0x78] sm:$0xff]  ;;  %v626_v7 = vld [vmem:[#allocation11 + $0x70] sm:$0xff] }
 0x21f   : > { %v2356_v32 = vsel %vm662_vm7, 1.0, %v2090_v31  ;;  %vm668_vm8 = vmxor %vm634_vm3, %vm2089_vm4  ;;  %v1469_v38 = vadd.f32 2.5, %v2347_v29  ;;  %v776_v41 = vsub.f32 -0.5, %v2347_v29  ;;  %vm640_vm12 = vcmp.ge.f32.partialorder %v2334_v28, 0.2  ;;  %1661 = vmatpush3.msra.mxu1 %v627_v58  ;;  %1625 = vmatprep.subr.mxu0 %v1112_v6  ;;  %v1111_v11 = vld [vmem:[#allocation12 + $0x70] sm:$0xff] }
 0x220   : > { %vm670_vm10 = vmand %vm632_vm2, %vm668_vm8  ;;  %v754_v40 = vmul.f32 %v1465_v33, %v2356_v32  ;;  %v1485_v44 = vadd.f32 2.25, %v2353_v30  ;;  %v858_v45 = vsub.f32 -0.75, %v2353_v30  ;;  %v1487_v47 = vadd.f32 1.75, %v2353_v30  ;;  %1662 = vmatprep.subr.mxu1 %v626_v7  ;;  %1626 = vmatpush3.msra.mxu0 %v1112_v6 }
 0x221   : > { %v1445_v39 = vsel %vm670_vm10, 1.0, %v2090_v31  ;;  %vm676_vm11 = vmxor %vm636_vm6, %vm2089_vm4  ;;  %v868_v48 = vsub.f32 -0.25, %v2353_v30  ;;  %v1503_v49 = vadd.f32 1.5, %v2364_v35  ;;  %v1471_v53 = vadd.f32 1.5, %v2347_v29  ;;  %1663 = vmatpush3.msra.mxu1 %v626_v7  ;;  %1627 = vmatprep.subr.mxu0 %v1111_v11 }
 0x222   : > { %vm678_vm13 = vmand %vm634_vm3, %vm676_vm11  ;;  %v758_v42 = vmul.f32 %v1445_v39, %v756_v34  ;;  %v764_v43 = vmul.f32 %v1467_v36, %v1445_v39  ;;  %v950_v55 = vsub.f32 -0.16666667, %v2364_v35  ;;  %v786_v56 = vsub.f32 0.5, %v2347_v29  ;;  %1628 = vmatpush3.msra.mxu0 %v1111_v11 }
 0x223   : > { %v1447_v46 = vsel %vm678_vm13, 1.0, %v2090_v31  ;;  %vm684_vm14 = vmxor %vm638_vm9, %vm2089_vm4  ;;  %v2399_v57 = vadd.f32 0.5, %v2347_v29  ;;  %v1489_v62 = vadd.f32 1.25, %v2353_v30  ;;  %v1505_v0 = vadd.f32 1.1666666, %v2364_v35 }
 0x224   : > { %vm686_vm15 = vmand %vm636_vm6, %vm684_vm14  ;;  %v2392_v50 = vadd.f32 %v758_v42, %v754_v40  ;;  %v768_v51 = vmul.f32 %v1447_v46, %v766_v37  ;;  %v774_v52 = vmul.f32 %v1469_v38, %v1447_v46  ;;  %v960_v1 = vsub.f32 0.16666667, %v2364_v35 }
 0x225   : > { %v1449_v54 = vsel %vm686_vm15, 1.0, %v2090_v31  ;;  %vm692_vm2 = vmxor %vm640_vm12, %vm2089_vm4  ;;  %vm635_vm5 = vcmp.ge.f32.partialorder %v2331_v27, -1.0  ;;  %v878_v9 = vsub.f32 0.25, %v2353_v30  ;;  %vm631_vm6 = vcmp.ge.f32.partialorder %v2331_v27, -1.8 }
 0x226   : > { %v770_v59 = vadd.f32 %v768_v51, %v764_v43  ;;  %v778_v60 = vmul.f32 %v1449_v54, %v776_v41  ;;  %v856_v61 = vmul.f32 %v1485_v44, %v2392_v50  ;;  %vm694_vm3 = vmand %vm638_vm9, %vm692_vm2  ;;  %v784_v63 = vmul.f32 %v1471_v53, %v1449_v54  ;;  %v625_v54 = vld [vmem:[#allocation11 + $0x68] sm:$0xff] }
 0x227   : > { %v2412_v5 = vsel %vm694_vm3, 1.0, %v2090_v31  ;;  %vm633_vm7 = vcmp.ge.f32.partialorder %v2331_v27, -1.4  ;;  %vm2421_vm8 = vmxor %vm635_vm5, %vm2089_vm4  ;;  %vm637_vm9 = vcmp.ge.f32.partialorder %v2331_v27, -0.6  ;;  %v2437_v16 = vmul.f32 2.5, %v2331_v27  ;;  %1664 = vmatprep.subr.mxu1 %v625_v54 }
 0x228   : > { %v780_v2 = vadd.f32 %v778_v60, %v774_v52  ;;  %v860_v3 = vmul.f32 %v858_v45, %v770_v59  ;;  %v866_v4 = vmul.f32 %v1487_v47, %v770_v59  ;;  %v788_v8 = vmul.f32 %v2412_v5, %v786_v56  ;;  %vm661_vm10 = vmxor %vm633_vm7, %vm2089_vm4  ;;  %1665 = vmatpush3.msra.mxu1 %v625_v54 }
 0x229   : > { %vm639_vm11 = vcmp.ge.f32.partialorder %v2331_v27, -0.2  ;;  %vm663_vm13 = vmand %vm631_vm6, %vm661_vm10  ;;  %v2440_v17 = vmul.f32 1.25, %v2331_v27  ;;  %v2451_v21 = vmul.f32 0.8333333, %v2331_v27  ;;  %v1466_v24 = vadd.f32 4.5, %v2437_v16 }
 0x22a   : > { %v2425_v12 = vadd.f32 %v860_v3, %v856_v61  ;;  %v870_v13 = vmul.f32 %v868_v48, %v780_v2  ;;  %v876_v14 = vmul.f32 %v1489_v62, %v780_v2  ;;  %v2431_v15 = vadd.f32 %v788_v8, %v784_v63  ;;  %vm671_vm14 = vmand %vm633_vm7, %vm2421_vm8 }
 0x22b   : > { %v2444_v20 = vsel %vm663_vm13, 1.0, %v2090_v31  ;;  %v1446_v23 = vsel %vm671_vm14, 1.0, %v2090_v31  ;;  %vm677_vm15 = vmxor %vm637_vm9, %vm2089_vm4  ;;  %v757_v25 = vsub.f32 -2.5, %v2437_v16  ;;  %v1468_v34 = vadd.f32 3.5, %v2437_v16 }
 0x22c   : > { %v872_v18 = vadd.f32 %v870_v13, %v866_v4  ;;  %v948_v19 = vmul.f32 %v1503_v49, %v2425_v12  ;;  %v880_v22 = vmul.f32 %v878_v9, %v2431_v15  ;;  %vm679_vm2 = vmand %vm635_vm5, %vm677_vm15  ;;  %v767_v36 = vsub.f32 -1.5, %v2437_v16 }
 0x22d   : > { %v1448_v38 = vsel %vm679_vm2, 1.0, %v2090_v31  ;;  %vm685_vm3 = vmxor %vm639_vm11, %vm2089_vm4  ;;  %v755_v39 = vmul.f32 %v1466_v24, %v2444_v20  ;;  %v759_v40 = vmul.f32 %v1446_v23, %v757_v25  ;;  %v765_v42 = vmul.f32 %v1468_v34, %v1446_v23 }
 0x22e   : > { %v952_v26 = vmul.f32 %v950_v55, %v872_v18  ;;  %v958_v33 = vmul.f32 %v1505_v0, %v872_v18  ;;  %v2464_v37 = vadd.f32 %v880_v22, %v876_v14  ;;  %vm687_vm7 = vmand %vm637_vm9, %vm685_vm3  ;;  %v769_v43 = vmul.f32 %v1448_v38, %v767_v36  ;;  %v1110_v18 = vld [vmem:[#allocation12 + $0x68] sm:$0xff]  ;;  %v1109_v22 = vld [vmem:[#allocation12 + $0x60] sm:$0xff] }
 0x22f   : > { %v1470_v44 = vadd.f32 2.5, %v2437_v16  ;;  %v1450_v46 = vsel %vm687_vm7, 1.0, %v2090_v31  ;;  %v2476_v47 = vadd.f32 %v759_v40, %v755_v39  ;;  %v777_v48 = vsub.f32 -0.5, %v2437_v16  ;;  %1629 = vmatprep.subr.mxu0 %v1110_v18  ;;  %v623_v40 = vld [vmem:[#allocation11 + $0x58] sm:$0xff] }
 0x230   : > { %v954_v41 = vadd.f32 %v952_v26, %v948_v19  ;;  %v962_v45 = vmul.f32 %v960_v1, %v2464_v37  ;;  %v771_v49 = vadd.f32 %v769_v43, %v765_v42  ;;  %v1486_v52 = vadd.f32 2.25, %v2440_v17  ;;  %v624_v19 = vld [vmem:[#allocation11 + $0x60] sm:$0xff]  ;;  %1630 = vmatpush3.msra.mxu0 %v1110_v18  ;;  %v621_v18 = vld [vmem:[#allocation11 + $0x48] sm:$0xff] }
 0x231   : > { %v775_v51 = vmul.f32 %v1470_v44, %v1448_v38  ;;  %v859_v53 = vsub.f32 -0.75, %v2440_v17  ;;  %v779_v56 = vmul.f32 %v1450_v46, %v777_v48  ;;  %v1488_v58 = vadd.f32 1.75, %v2440_v17  ;;  %1666 = vmatprep.subr.mxu1 %v624_v19  ;;  %1631 = vmatprep.subr.mxu0 %v1109_v22 }
 0x232   : > { %1020 = vrot.lane.b32.xlu0 %v954_v41, %s2091_s27  ;;  %v964_v55 = vadd.f32 %v962_v45, %v958_v33  ;;  %v869_v59 = vsub.f32 -0.25, %v2440_v17  ;;  %v857_v60 = vmul.f32 %v1486_v52, %v2476_v47  ;;  %v1504_v62 = vadd.f32 1.5, %v2451_v21  ;;  %1667 = vmatpush3.msra.mxu1 %v624_v19 }
 0x233   : > { %v861_v61 = vmul.f32 %v859_v53, %v771_v49  ;;  %v951_v63 = vsub.f32 -0.16666667, %v2451_v21  ;;  %v781_v0 = vadd.f32 %v779_v56, %v775_v51  ;;  %v867_v1 = vmul.f32 %v1488_v58, %v771_v49  ;;  %1668 = vmatprep.subr.mxu1 %v623_v40  ;;  %1632 = vmatpush3.msra.mxu0 %v1109_v22  ;;  %v622_v56 = vld [vmem:[#allocation11 + $0x50] sm:$0xff] }
 0x234   : > { %1031 = vrot.lane.b32.xlu1 %v964_v55, %s2092_s24  ;;  %vm641_vm5 = vcmp.ge.f32.partialorder %v2331_v27, 0.2  ;;  %v1472_v2 = vadd.f32 1.5, %v2437_v16  ;;  %v787_v4 = vsub.f32 0.5, %v2437_v16  ;;  %v1490_v6 = vadd.f32 1.25, %v2440_v17  ;;  %1669 = vmatpush3.msra.mxu1 %v623_v40  ;;  %v1108_v55 = vld [vmem:[#allocation12 + $0x58] sm:$0xff] }
 0x235   : > { %v2490_v3 = vadd.f32 %v861_v61, %v857_v60  ;;  %vm693_vm8 = vmxor %vm641_vm5, %vm2089_vm4  ;;  %v879_v7 = vsub.f32 0.25, %v2440_v17  ;;  %v871_v8 = vmul.f32 %v869_v59, %v781_v0  ;;  %v1506_v10 = vadd.f32 1.1666666, %v2451_v21  ;;  %v1107_v58 = vld [vmem:[#allocation12 + $0x50] sm:$0xff]  ;;  %1633 = vmatprep.subr.mxu0 %v1108_v55  ;;  %1670 = vmatprep.subr.mxu1 %v622_v56 }
 0x236   : > { %vm695_vm9 = vmand %vm639_vm11, %vm693_vm8  ;;  %v785_v9 = vmul.f32 %v1472_v2, %v1450_v46  ;;  %v961_v11 = vsub.f32 0.16666667, %v2451_v21  ;;  %v794_v13 = vmul.f32 %v2399_v57, %v2412_v5  ;;  %vm642_vm10 = vcmp.ge.f32.partialorder %v2334_v28, 0.6  ;;  %1634 = vmatpush3.msra.mxu0 %v1108_v55  ;;  %1671 = vmatpush3.msra.mxu1 %v622_v56 }
 0x237   : > { %v1452_v14 = vsel %vm695_vm9, 1.0, %v2090_v31  ;;  %v873_v23 = vadd.f32 %v871_v8, %v867_v1  ;;  %v949_v24 = vmul.f32 %v1504_v62, %v2490_v3  ;;  %vm700_vm11 = vmxor %vm642_vm10, %vm2089_vm4  ;;  %v796_v26 = vsub.f32 1.5, %v2347_v29  ;;  %1635 = vmatprep.subr.mxu0 %v1107_v58  ;;  %1672 = vmatprep.subr.mxu1 %v621_v18 }
 0x238   : > { %v789_v25 = vmul.f32 %v1452_v14, %v787_v4  ;;  %v877_v57 = vmul.f32 %v1490_v6, %v781_v0  ;;  %vm702_vm13 = vmand %vm640_vm12, %vm700_vm11  ;;  %v1491_v5 = vadd.f32 0.75, %v2353_v30  ;;  %v888_v33 = vsub.f32 0.75, %v2353_v30  ;;  %1636 = vmatpush3.msra.mxu0 %v1107_v58  ;;  %1673 = vmatpush3.msra.mxu1 %v621_v18 }
 0x239   : > { %vm643_vm14 = vcmp.ge.f32.partialorder %v2331_v27, 0.6  ;;  %v953_v34 = vmul.f32 %v951_v63, %v873_v23  ;;  %v1453_v38 = vsel %vm702_vm13, 1.0, %v2090_v31  ;;  %v1507_v39 = vadd.f32 0.8333333, %v2364_v35 }
 0x23a   : > { %v791_v36 = vadd.f32 %v789_v25, %v785_v9  ;;  %vm701_vm15 = vmxor %vm643_vm14, %vm2089_vm4  ;;  %v959_v41 = vmul.f32 %v1506_v10, %v873_v23  ;;  %v798_v42 = vmul.f32 %v1453_v38, %v796_v26  ;;  %v970_v43 = vsub.f32 0.5, %v2364_v35 }
 0x23b   : > { %vm703_vm12 = vmand %vm641_vm5, %vm701_vm15  ;;  %v1474_v44 = vadd.f32 0.5, %v2437_v16  ;;  %v955_v45 = vadd.f32 %v953_v34, %v949_v24  ;;  %v797_v49 = vsub.f32 1.5, %v2437_v16  ;;  %v886_v52 = vmul.f32 %v1491_v5, %v2431_v15 }
 0x23c   : > { %v881_v46 = vmul.f32 %v879_v7, %v791_v36  ;;  %v1454_v48 = vsel %vm703_vm12, 1.0, %v2090_v31  ;;  %v800_v51 = vadd.f32 %v798_v42, %v794_v13  ;;  %v1492_v54 = vadd.f32 0.75, %v2440_v17 }
 0x23d   : > { %v795_v53 = vmul.f32 %v1474_v44, %v1452_v14  ;;  %1022 = vrot.lane.b32.xlu0 %v955_v45, %s2091_s27  ;;  %v799_v60 = vmul.f32 %v1454_v48, %v797_v49  ;;  %v889_v61 = vsub.f32 0.75, %v2440_v17  ;;  %v1508_v62 = vadd.f32 0.8333333, %v2451_v21  ;;  %v1106_v45 = vld [vmem:[#allocation12 + $0x48] sm:$0xff]  ;;  %v1105_v49 = vld [vmem:[#allocation12 + $0x40] sm:$0xff] }
 0x23e   : > { %v883_v59 = vadd.f32 %v881_v46, %v877_v57  ;;  %v890_v63 = vmul.f32 %v888_v33, %v800_v51  ;;  %v968_v0 = vmul.f32 %v1507_v39, %v2464_v37  ;;  %vm644_vm2 = vcmp.ge.f32.partialorder %v2334_v28, 1.0  ;;  %v620_v46 = vld [vmem:[#allocation11 + $0x40] sm:$0xff]  ;;  %1637 = vmatprep.subr.mxu0 %v1106_v45 }
 0x23f   : > { %v1475_v15 = vadd.f32 -0.5, %v2347_v29  ;;  %v801_v2 = vadd.f32 %v799_v60, %v795_v53  ;;  %v887_v4 = vmul.f32 %v1492_v54, %v791_v36  ;;  %vm708_vm3 = vmxor %vm644_vm2, %vm2089_vm4  ;;  %v806_v6 = vsub.f32 2.5, %v2347_v29  ;;  %1674 = vmatprep.subr.mxu1 %v620_v46  ;;  %1638 = vmatpush3.msra.mxu0 %v1106_v45 }
 0x240   : > { %v963_v1 = vmul.f32 %v961_v11, %v883_v59  ;;  %v892_v7 = vadd.f32 %v890_v63, %v886_v52  ;;  %v971_v37 = vsub.f32 0.5, %v2451_v21  ;;  %vm710_vm7 = vmand %vm642_vm10, %vm708_vm3  ;;  %v1493_v9 = vadd.f32 0.25, %v2353_v30  ;;  %1675 = vmatpush3.msra.mxu1 %v620_v46  ;;  %1639 = vmatprep.subr.mxu0 %v1105_v49 }
 0x241   : > { %v804_v8 = vmul.f32 %v1475_v15, %v1453_v38  ;;  %v891_v11 = vmul.f32 %v889_v61, %v801_v2  ;;  %v969_v13 = vmul.f32 %v1508_v62, %v883_v59  ;;  %v1455_v14 = vsel %vm710_vm7, 1.0, %v2090_v31  ;;  %1640 = vmatpush3.msra.mxu0 %v1105_v49 }
 0x242   : > { %v965_v10 = vadd.f32 %v963_v1, %v959_v41  ;;  %v972_v19 = vmul.f32 %v970_v43, %v892_v7  ;;  %v808_v22 = vmul.f32 %v1455_v14, %v806_v6  ;;  %v898_v23 = vsub.f32 1.25, %v2353_v30  ;;  %v619_v1 = vld [vmem:[#allocation11 + $0x38] sm:$0xff] }
 0x243   : > { %v1509_v24 = vadd.f32 0.5, %v2364_v35  ;;  %v893_v25 = vadd.f32 %v891_v11, %v887_v4  ;;  %v896_v26 = vmul.f32 %v1493_v9, %v800_v51  ;;  %vm645_vm5 = vcmp.ge.f32.partialorder %v2331_v27, 1.0  ;;  %1676 = vmatprep.subr.mxu1 %v619_v1 }
 0x244   : > { %1033 = vrot.lane.b32.xlu1 %v965_v10, %s2092_s24  ;;  %v1476_v57 = vadd.f32 -0.5, %v2437_v16  ;;  %v974_v5 = vadd.f32 %v972_v19, %v968_v0  ;;  %v810_v33 = vadd.f32 %v808_v22, %v804_v8  ;;  %vm709_vm8 = vmxor %vm645_vm5, %vm2089_vm4  ;;  %v807_v34 = vsub.f32 2.5, %v2437_v16  ;;  %1677 = vmatpush3.msra.mxu1 %v619_v1  ;;  %v1102_v1 = vld [vmem:[#allocation12 + $0x28] sm:$0xff] }
 0x245   : > { %v1494_v36 = vadd.f32 0.25, %v2440_v17  ;;  %v973_v38 = vmul.f32 %v971_v37, %v893_v25  ;;  %vm711_vm9 = vmand %vm643_vm14, %vm709_vm8  ;;  %v1510_v40 = vadd.f32 0.5, %v2451_v21  ;;  %v978_v42 = vmul.f32 %v1509_v24, %v892_v7  ;;  %v1104_v24 = vld [vmem:[#allocation12 + $0x38] sm:$0xff] }
 0x246   : > { %v805_v39 = vmul.f32 %v1476_v57, %v1454_v48  ;;  %1042 = vrot.lane.b32.xlu0 %v974_v5, %s2093_s11  ;;  %v900_v41 = vmul.f32 %v898_v23, %v810_v33  ;;  %v980_v43 = vsub.f32 0.8333333, %v2364_v35  ;;  %v1456_v44 = vsel %vm711_vm9, 1.0, %v2090_v31  ;;  %1641 = vmatprep.subr.mxu0 %v1104_v24 }
 0x247   : > { %v975_v51 = vadd.f32 %v973_v38, %v969_v13  ;;  %v809_v52 = vmul.f32 %v1456_v44, %v807_v34  ;;  %v899_v53 = vsub.f32 1.25, %v2440_v17  ;;  %vm646_vm10 = vcmp.ge.f32.partialorder %v2334_v28, 1.4  ;;  %1642 = vmatpush3.msra.mxu0 %v1104_v24 }
 0x248   : > { %v902_v48 = vadd.f32 %v900_v41, %v896_v26  ;;  %v897_v54 = vmul.f32 %v1494_v36, %v801_v2  ;;  %vm716_vm11 = vmxor %vm646_vm10, %vm2089_vm4  ;;  %v1477_v55 = vadd.f32 -1.5, %v2347_v29  ;;  %v816_v56 = vsub.f32 3.5, %v2347_v29  ;;  %v1103_v26 = vld [vmem:[#allocation12 + $0x30] sm:$0xff] }
 0x249   : > { %1044 = vrot.lane.b32.xlu1 %v975_v51, %s2093_s11  ;;  %v811_v58 = vadd.f32 %v809_v52, %v805_v39  ;;  %v979_v59 = vmul.f32 %v1510_v40, %v893_v25  ;;  %v981_v60 = vsub.f32 0.8333333, %v2451_v21  ;;  %vm718_vm13 = vmand %vm644_vm2, %vm716_vm11  ;;  %v1495_v61 = vadd.f32 -0.25, %v2353_v30  ;;  %v618_v25 = vld [vmem:[#allocation11 + $0x30] sm:$0xff]  ;;  %1643 = vmatprep.subr.mxu0 %v1103_v26 }
 0x24a   : > { %v982_v62 = vmul.f32 %v980_v43, %v902_v48  ;;  %v1457_v63 = vsel %vm718_vm13, 1.0, %v2090_v31  ;;  %v814_v0 = vmul.f32 %v1477_v55, %v1455_v14  ;;  %v1511_v15 = vadd.f32 0.16666667, %v2364_v35  ;;  %1678 = vmatprep.subr.mxu1 %v618_v25  ;;  %1644 = vmatpush3.msra.mxu0 %v1103_v26 }
 0x24b   : > { %v901_v2 = vmul.f32 %v899_v53, %v811_v58  ;;  %v818_v4 = vmul.f32 %v1457_v63, %v816_v56  ;;  %v908_v6 = vsub.f32 1.75, %v2353_v30  ;;  %vm647_vm14 = vcmp.ge.f32.partialorder %v2331_v27, 1.4  ;;  %1679 = vmatpush3.msra.mxu1 %v618_v25  ;;  %v617_v53 = vld [vmem:[#allocation11 + $0x28] sm:$0xff]  ;;  %1645 = vmatprep.subr.mxu0 %v1102_v1 }
 0x24c   : > { %v984_v7 = vadd.f32 %v982_v62, %v978_v42  ;;  %vm717_vm15 = vmxor %vm647_vm14, %vm2089_vm4  ;;  %v1478_v37 = vadd.f32 -1.5, %v2437_v16  ;;  %v817_v8 = vsub.f32 3.5, %v2437_v16  ;;  %v1496_v9 = vadd.f32 -0.25, %v2440_v17  ;;  %1680 = vmatprep.subr.mxu1 %v617_v53  ;;  %1646 = vmatpush3.msra.mxu0 %v1102_v1 }
 0x24d   : > { %v903_v10 = vadd.f32 %v901_v2, %v897_v54  ;;  %v820_v11 = vadd.f32 %v818_v4, %v814_v0  ;;  %v906_v13 = vmul.f32 %v1495_v61, %v810_v33  ;;  %v990_v14 = vsub.f32 1.1666666, %v2364_v35  ;;  %vm719_vm12 = vmand %vm645_vm5, %vm717_vm15  ;;  %1681 = vmatpush3.msra.mxu1 %v617_v53  ;;  %v616_v2 = vld [vmem:[#allocation11 + $0x20] sm:$0xff] }
 0x24e   : > { %1053 = vrot.lane.b32.xlu0 %v984_v7, %s2094_s10  ;;  %v988_v18 = vmul.f32 %v1511_v15, %v902_v48  ;;  %v1458_v19 = vsel %vm719_vm12, 1.0, %v2090_v31  ;;  %v815_v22 = vmul.f32 %v1478_v37, %v1456_v44  ;;  %v1512_v23 = vadd.f32 0.16666667, %v2451_v21  ;;  %v1101_v4 = vld [vmem:[#allocation12 + $0x20] sm:$0xff]  ;;  %1682 = vmatprep.subr.mxu1 %v616_v2 }
 0x24f   : > { %v983_v57 = vmul.f32 %v981_v60, %v903_v10  ;;  %v910_v5 = vmul.f32 %v908_v6, %v820_v11  ;;  %v819_v33 = vmul.f32 %v1458_v19, %v817_v8  ;;  %v909_v34 = vsub.f32 1.75, %v2440_v17  ;;  %1683 = vmatpush3.msra.mxu1 %v616_v2  ;;  %1647 = vmatprep.subr.mxu0 %v1101_v4  ;;  %v1098_v2 = vld [vmem:[#allocation12 + $0x8] sm:$0xff] }
 0x250   : > { %v907_v36 = vmul.f32 %v1496_v9, %v811_v58  ;;  %vm648_vm2 = vcmp.ge.f32.partialorder %v2334_v28, 1.8  ;;  %v1479_v38 = vadd.f32 -2.5, %v2347_v29  ;;  %v826_v39 = vsub.f32 4.5, %v2347_v29  ;;  %1648 = vmatpush3.msra.mxu0 %v1101_v4  ;;  %v612_v4 = vld [vmem:[#allocation11] sm:$0xff] }
 0x251   : > { %v985_v40 = vadd.f32 %v983_v57, %v979_v59  ;;  %v912_v41 = vadd.f32 %v910_v5, %v906_v13  ;;  %v821_v42 = vadd.f32 %v819_v33, %v815_v22  ;;  %vm724_vm3 = vmxor %vm648_vm2, %vm2089_vm4  ;;  %v1497_v43 = vadd.f32 -0.75, %v2353_v30 }
 0x252   : > { %v989_v44 = vmul.f32 %v1512_v23, %v903_v10  ;;  %v991_v45 = vsub.f32 1.1666666, %v2451_v21  ;;  %vm726_vm7 = vmand %vm646_vm10, %vm724_vm3  ;;  %v824_v46 = vmul.f32 %v1479_v38, %v1457_v63  ;;  %vm649_vm5 = vcmp.ge.f32.partialorder %v2331_v27, 1.8 }
 0x253   : > { %1055 = vrot.lane.b32.xlu1 %v985_v40, %s2094_s10  ;;  %v992_v49 = vmul.f32 %v990_v14, %v912_v41  ;;  %v911_v51 = vmul.f32 %v909_v34, %v821_v42  ;;  %v1459_v52 = vsel %vm726_vm7, 1.0, %v2090_v31  ;;  %v918_v54 = vsub.f32 2.25, %v2353_v30  ;;  %vm725_vm8 = vmxor %vm649_vm5, %vm2089_vm4  ;;  %v615_v34 = vld [vmem:[#allocation11 + $0x18] sm:$0xff] }
 0x254   : > { %v828_v48 = vmul.f32 %v1459_v52, %v826_v39  ;;  %v1480_v55 = vadd.f32 -2.5, %v2437_v16  ;;  %v827_v56 = vsub.f32 4.5, %v2437_v16  ;;  %v916_v60 = vmul.f32 %v1497_v43, %v820_v11  ;;  %vm727_vm9 = vmand %vm647_vm14, %vm725_vm8  ;;  %1684 = vmatprep.subr.mxu1 %v615_v34 }
 0x255   : > { %v994_v58 = vadd.f32 %v992_v49, %v988_v18  ;;  %v913_v59 = vadd.f32 %v911_v51, %v907_v36  ;;  %v1498_v61 = vadd.f32 -0.75, %v2440_v17  ;;  %v1513_v63 = vadd.f32 -0.16666667, %v2364_v35  ;;  %1685 = vmatpush3.msra.mxu1 %v615_v34  ;;  %v1100_v51 = vld [vmem:[#allocation12 + $0x18] sm:$0xff]  ;;  %vm2656_vm7 = vmxor %vm631_vm6, %vm2089_vm4 }
 0x256   : > { %v830_v62 = vadd.f32 %v828_v48, %v824_v46  ;;  %v1460_v0 = vsel %vm727_vm9, 1.0, %v2090_v31  ;;  %v825_v15 = vmul.f32 %v1480_v55, %v1458_v19  ;;  %v919_v37 = vsub.f32 2.25, %v2440_v17  ;;  %1649 = vmatprep.subr.mxu0 %v1100_v51 }
 0x257   : > { %1064 = vrot.lane.b32.xlu0 %v994_v58, %s2095_s14  ;;  %v993_v6 = vmul.f32 %v991_v45, %v913_v59  ;;  %v829_v7 = vmul.f32 %v1460_v0, %v827_v56  ;;  %v1514_v8 = vadd.f32 -0.16666667, %v2451_v21  ;;  %v1000_v10 = vsub.f32 1.5, %v2364_v35  ;;  %v1099_v56 = vld [vmem:[#allocation12 + $0x10] sm:$0xff]  ;;  %v613_v58 = vld [vmem:[#allocation11 + $0x8] sm:$0xff]  ;;  %1650 = vmatpush3.msra.mxu0 %v1100_v51 }
 0x258   : > { %v920_v9 = vmul.f32 %v918_v54, %v830_v62  ;;  %vm650_vm10 = vcmp.ge.f32.partialorder %v2334_v28, 2.2  ;;  %v1481_v11 = vadd.f32 -3.5, %v2347_v29  ;;  %v917_v18 = vmul.f32 %v1498_v61, %v821_v42  ;;  %1651 = vmatprep.subr.mxu0 %v1099_v56 }
 0x259   : > { %v995_v13 = vadd.f32 %v993_v6, %v989_v44  ;;  %v831_v14 = vadd.f32 %v829_v7, %v825_v15  ;;  %vm732_vm11 = vmxor %vm650_vm10, %vm2089_vm4  ;;  %v836_v19 = vsub.f32 5.5, %v2347_v29  ;;  %v998_v23 = vmul.f32 %v1513_v63, %v912_v41  ;;  %1652 = vmatpush3.msra.mxu0 %v1099_v56 }
 0x25a   : > { %v922_v22 = vadd.f32 %v920_v9, %v916_v60  ;;  %vm734_vm13 = vmand %vm648_vm2, %vm732_vm11  ;;  %v834_v24 = vmul.f32 %v1481_v11, %v1459_v52  ;;  %v1499_v25 = vadd.f32 -1.25, %v2353_v30  ;;  %v999_v57 = vmul.f32 %v1514_v8, %v913_v59  ;;  %v614_v52 = vld [vmem:[#allocation11 + $0x10] sm:$0xff]  ;;  %1653 = vmatprep.subr.mxu0 %v1098_v2 }
 0x25b   : > { %1066 = vrot.lane.b32.xlu1 %v995_v13, %s2095_s14  ;;  %v921_v26 = vmul.f32 %v919_v37, %v831_v14  ;;  %v1001_v5 = vsub.f32 1.5, %v2451_v21  ;;  %v1461_v33 = vsel %vm734_vm13, 1.0, %v2090_v31  ;;  %v928_v39 = vsub.f32 2.75, %v2353_v30  ;;  %1686 = vmatprep.subr.mxu1 %v614_v52  ;;  %vm2639_vm2 = vmxor %vm630_vm1, %vm2089_vm4 }
 0x25c   : > { %v1002_v36 = vmul.f32 %v1000_v10, %v922_v22  ;;  %v838_v38 = vmul.f32 %v1461_v33, %v836_v19  ;;  %vm651_vm14 = vcmp.ge.f32.partialorder %v2331_v27, 2.2  ;;  %v1515_v41 = vadd.f32 -0.5, %v2364_v35  ;;  %1687 = vmatpush3.msra.mxu1 %v614_v52  ;;  %v1097_v10 = vld [vmem:[#allocation12] sm:$0xff]  ;;  %1654 = vmatpush3.msra.mxu0 %v1098_v2 }
 0x25d   : > { %v923_v40 = vadd.f32 %v921_v26, %v917_v18  ;;  %vm733_vm15 = vmxor %vm651_vm14, %vm2089_vm4  ;;  %v1482_v42 = vadd.f32 -3.5, %v2437_v16  ;;  %v837_v43 = vsub.f32 5.5, %v2437_v16  ;;  %v926_v46 = vmul.f32 %v1499_v25, %v830_v62  ;;  %1688 = vmatprep.subr.mxu1 %v613_v58  ;;  %1655 = vmatprep.subr.mxu0 %v1097_v10 }
 0x25e   : > { %v1004_v44 = vadd.f32 %v1002_v36, %v998_v23  ;;  %v840_v45 = vadd.f32 %v838_v38, %v834_v24  ;;  %vm735_vm12 = vmand %vm649_vm5, %vm733_vm15  ;;  %v1500_v49 = vadd.f32 -1.25, %v2440_v17  ;;  %v746_v53 = vsub.f32 -3.5, %v2347_v29  ;;  %1689 = vmatpush3.msra.mxu1 %v613_v58  ;;  %1656 = vmatpush3.msra.mxu0 %v1097_v10 }
 0x25f   : > { %v1003_v48 = vmul.f32 %v1001_v5, %v923_v40  ;;  %v1462_v54 = vsel %vm735_vm12, 1.0, %v2090_v31  ;;  %v835_v55 = vmul.f32 %v1482_v42, %v1460_v0  ;;  %v1010_v60 = vsub.f32 1.8333334, %v2364_v35  ;;  %1690 = vmatprep.subr.mxu1 %v612_v4 }
 0x260   : > { %1075 = vrot.lane.b32.xlu0 %v1004_v44, %s2096_s18  ;;  %v930_v59 = vmul.f32 %v928_v39, %v840_v45  ;;  %v839_v61 = vmul.f32 %v1462_v54, %v837_v43  ;;  %v929_v62 = vsub.f32 2.75, %v2440_v17  ;;  %v1008_v15 = vmul.f32 %v1515_v41, %v922_v22  ;;  %1691 = vmatpush3.msra.mxu1 %v612_v4 }
 0x261   : > { %v1005_v0 = vadd.f32 %v1003_v48, %v999_v57  ;;  %v1516_v1 = vadd.f32 -0.5, %v2451_v21  ;;  %v927_v37 = vmul.f32 %v1500_v49, %v831_v14  ;;  %v1463_v8 = vadd.f32 5.5, %v2347_v29 }
 0x262   : > { %v932_v6 = vadd.f32 %v930_v59, %v926_v46  ;;  %v841_v7 = vadd.f32 %v839_v61, %v835_v55  ;;  %v848_v9 = vsub.f32 -1.25, %v2353_v30  ;;  %vm628_vm1 = vcmp.ge.f32.partialorder %v2334_v28, -2.2 }
 0x263   : > { %1077 = vrot.lane.b32.xlu1 %v1005_v0, %s2096_s18  ;;  %v748_v11 = vmul.f32 %v2356_v32, %v746_v53  ;;  %v1011_v19 = vsub.f32 1.8333334, %v2451_v21  ;;  %vm654_vm3 = vmand %vm628_vm1, %vm2639_vm2  ;;  %v1009_v29 = vmul.f32 %v1516_v1, %v923_v40  ;;  %v1483_v14 = vadd.f32 2.75, %v2353_v30 }
 0x264   : > { %v1012_v13 = vmul.f32 %v1010_v60, %v932_v6  ;;  %v931_v18 = vmul.f32 %v929_v62, %v841_v7  ;;  %v1441_v22 = vsel %vm654_vm3, 1.0, %v2090_v31  ;;  %v747_v32 = vsub.f32 -3.5, %v2437_v16 }
 0x265   : > { %v744_v26 = vmul.f32 %v1463_v8, %v1441_v22  ;;  %v1464_v57 = vadd.f32 5.5, %v2437_v16  ;;  %v940_v30 = vsub.f32 -0.5, %v2364_v35  ;;  %v850_v5 = vmul.f32 %v848_v9, %v2392_v50 }
 0x266   : > { %v1014_v24 = vadd.f32 %v1012_v13, %v1008_v15  ;;  %v933_v25 = vadd.f32 %v931_v18, %v927_v37  ;;  %vm629_vm5 = vcmp.ge.f32.partialorder %v2331_v27, -2.2  ;;  %v749_v36 = vmul.f32 %v2444_v20, %v747_v32 }
 0x267   : > { %v750_v34 = vadd.f32 %v748_v11, %v744_v26  ;;  %v849_v38 = vsub.f32 -1.25, %v2440_v17  ;;  %vm655_vm4 = vmand %vm629_vm5, %vm2656_vm7  ;;  %v1501_v16 = vadd.f32 1.8333334, %v2364_v35  ;;  %v1484_v41 = vadd.f32 2.75, %v2440_v17 }
 0x268   : > { %1086 = vrot.lane.b32.xlu0 %v1014_v24, %s2097_s19  ;;  %v1013_v33 = vmul.f32 %v1011_v19, %v933_v25  ;;  %v1442_v39 = vsel %vm655_vm4, 1.0, %v2090_v31  ;;  %v942_v43 = vmul.f32 %v940_v30, %v2425_v12  ;;  %v1439_v44 = vmul.f32 -1.442695, %v2334_v28 }
 0x269   : > { %v846_v50 = vmul.f32 %v1483_v14, %v750_v34  ;;  %v745_v42 = vmul.f32 %v1464_v57, %v1442_v39  ;;  %v1440_v20 = vmul.f32 -1.442695, %v2331_v27  ;;  %v851_v46 = vmul.f32 %v849_v38, %v2476_v47 }
 0x26a   : > { %v1015_v40 = vadd.f32 %v1013_v33, %v1009_v29  ;;  %v941_v49 = vsub.f32 -0.5, %v2451_v21  ;;  %1818 = vpow2.f32 %v1439_v44  ;;  %v1502_v51 = vadd.f32 1.8333334, %v2451_v21 }
 0x26b   : > { %v852_v45 = vadd.f32 %v850_v5, %v846_v50  ;;  %v751_v35 = vadd.f32 %v749_v36, %v745_v42  ;;  %1820 = vpow2.f32 %v1440_v20  ;;  %vm1026_vm6 = vcmask 261248  }
 0x26c   : > { %1088 = vrot.lane.b32.xlu1 %v1015_v40, %s2097_s19  ;;  %v943_v12 = vmul.f32 %v941_v49, %v2490_v3  ;;  %vm1037_vm8 = vcmask 392448   ;;  %vm1059_vm9 = vcmask 654848   ;;  %vm1070_vm10 = vcmask 786048  }
 0x26d   : > { %v938_v31 = vmul.f32 %v1501_v16, %v852_v45  ;;  %v847_v52 = vmul.f32 %v1484_v41, %v751_v35  ;;  %vm1081_vm11 = vcmask 917248   ;;  %vm1092_vm13 = vcmask 1048448  }
 0x26f   : > { %v944_v17 = vadd.f32 %v942_v43, %v938_v31  ;;  %v853_v53 = vadd.f32 %v851_v46, %v847_v52 }
 0x271   : > { %1016 = vst.msk [vmem:[#allocation4] sm:$0xff] %vm506_vm0, %v944_v17  ;;  %v939_v48 = vmul.f32 %v1502_v51, %v853_v53 }
 0x273   : > { %v945_v54 = vadd.f32 %v943_v12, %v939_v48 }
 0x275   : > { %1017 = vst.msk [vmem:[#allocation4 + $0x8] sm:$0xff] %vm506_vm0, %v945_v54  ;;  %vm1048_vm0 = vcmask 523648  }
 0x277   : > { %v1819_v47 = vpop.eup %1818 }
 0x278   : > { %v1821_v55 = vpop.eup %1820  ;;  %v604_v56 = vadd.f32 1.0, %v1819_v47 }
 0x279   : > { %v605_v58 = vadd.f32 1.0, %v1821_v55 }
 0x27a   : > { %1822 = vrcp.f32 %v604_v56 }
 0x27b   : > { %1824 = vrcp.f32 %v605_v58 }
 0x287   : > { %v1823_v59 = vpop.eup %1822 }
 0x288   : > { %v1825_v21 = vpop.eup %1824  ;;  %v610_v60 = vmul.f32 %v1823_v59, %v2334_v28 }
 0x289   : > { %v611_v61 = vmul.f32 %v1825_v21, %v2331_v27 }
 0x28a   : > { %1692 = vmatprep.mubr.f32.mxu1 %v610_v60 }
 0x28b   : > { %1693 = vmatmul.mubr.f32.vlgmr.msra.gmra.mxu1 %v611_v61 }
 0x2a4   : > { %v1021_v3 = vpop.permute.xlu0 %1020 }
 0x2a5   : > { %1027 = vst.msk [vmem:[#allocation4] sm:$0xff] %vm1026_vm6, %v1021_v3 }
 0x2a6   : > { %v1032_v62 = vpop.permute.xlu1 %1031 }
 0x2a7   : > { %1038 = vst.msk [vmem:[#allocation4] sm:$0xff] %vm1037_vm8, %v1032_v62 }
 0x2af   : > { %v1023_v63 = vpop.permute.xlu0 %1022 }
 0x2b0   : > { %1028 = vst.msk [vmem:[#allocation4 + $0x8] sm:$0xff] %vm1026_vm6, %v1023_v63 }
 0x2b6   : > { %v1034_v0 = vpop.permute.xlu1 %1033 }
 0x2b7   : > { %1039 = vst.msk [vmem:[#allocation4 + $0x8] sm:$0xff] %vm1037_vm8, %v1034_v0 }
 0x2b8   : > { %v1043_v15 = vpop.permute.xlu0 %1042 }
 0x2b9   : > { %1049 = vst.msk [vmem:[#allocation4] sm:$0xff] %vm1048_vm0, %v1043_v15 }
 0x2bb   : > { %v1045_v1 = vpop.permute.xlu1 %1044 }
 0x2bc   : > { %1050 = vst.msk [vmem:[#allocation4 + $0x8] sm:$0xff] %vm1048_vm0, %v1045_v1 }
 0x2c0   : > { %v1054_v28 = vpop.permute.xlu0 %1053 }
 0x2c1   : > { %1060 = vst.msk [vmem:[#allocation4] sm:$0xff] %vm1059_vm9, %v1054_v28 }
 0x2c5   : > { %v1056_v27 = vpop.permute.xlu1 %1055 }
 0x2c6   : > { %1061 = vst.msk [vmem:[#allocation4 + $0x8] sm:$0xff] %vm1059_vm9, %v1056_v27 }
 0x2c9   : > { %v1065_v2 = vpop.permute.xlu0 %1064 }
 0x2ca   : > { %1071 = vst.msk [vmem:[#allocation4] sm:$0xff] %vm1070_vm10, %v1065_v2 }
 0x2cd   : > { %v1067_v4 = vpop.permute.xlu1 %1066 }
 0x2ce   : > { %1072 = vst.msk [vmem:[#allocation4 + $0x8] sm:$0xff] %vm1070_vm10, %v1067_v4 }
 0x2d2   : > { %v1076_v6 = vpop.permute.xlu0 %1075 }
 0x2d3   : > { %1082 = vst.msk [vmem:[#allocation4] sm:$0xff] %vm1081_vm11, %v1076_v6 }
 0x2d5   : > { %v1078_v7 = vpop.permute.xlu1 %1077 }
 0x2d6   : > { %1083 = vst.msk [vmem:[#allocation4 + $0x8] sm:$0xff] %vm1081_vm11, %v1078_v7 }
 0x2da   : > { %v1087_v37 = vpop.permute.xlu0 %1086 }
 0x2db   : > { %1093 = vst.msk [vmem:[#allocation4] sm:$0xff] %vm1092_vm13, %v1087_v37 }
 0x2de   : > { %v1089_v8 = vpop.permute.xlu1 %1088 }
 0x2df   : > { %1094 = vst.msk [vmem:[#allocation4 + $0x8] sm:$0xff] %vm1092_vm13, %v1089_v8 }
 0x2e2   : > { %v1095_v9 = vld [vmem:[#allocation4] sm:$0xff] }
 0x2e3   : > { %1657 = vmatprep.mubr.f32.mxu0 %v1095_v9 }
 0x2e6   : > { %v1096_v10 = vld [vmem:[#allocation4 + $0x8] sm:$0xff] }
 0x2e7   : > { %1658 = vmatmul.mubr.f32.vlgmr.msra.gmra.mxu0 %v1096_v10 }
 0x34b   : > { %v1694_v11 = vpop.f32.mrf.mxu1 }
 0x34d   : > { %v1254_v19 = vpop.f32.mrf.mxu1 }
 0x3a7   : > { %v1659_v13 = vpop.f32.mrf.mxu0 }
 0x3a8   : > { %v1260_v18 = vadd.f32 %v1694_v11, %v1659_v13 }
 0x3a9   : > { %v1179_v29 = vpop.f32.mrf.mxu0 }
 0x3aa   : > { %1264 = vst [vmem:[#allocation14 + $0x8] sm:$0xff] %v1260_v18  ;;  %v1255_v14 = vadd.f32 %v1254_v19, %v1179_v29 }
 0x3ac   : > { %1263 = vst [vmem:[#allocation14] sm:$0xff] %v1255_v14 }
 0x3ad PF: > { %p1747_p4 = scmp.eq.s32.totalorder %s2171_s30, 2  ;;  %s2098_s22 = smov [#allocation14]  }
 0x3ae   : > { %s1274_s9 = sshll.u32 %s2098_s22, 4  ;;  %s1275_s9 = int_to_ptr.vmem [resolvable:$true] %s1274_s9 }
 0x3af   : > { %s1958_s15 = scalar_lea.vmem %s1275_s9, 256  ;;  %p1965_p3 = scmp.lt.s32.totalorder %s1275_s9, %s1275_s9 }
 0x3b0   : > { %p1959_p0 = scmp.ne.s32.totalorder %s1275_s9, %s1958_s15  ;;  %p1966_p6 = scmp.lt.s32.totalorder %s1958_s15, %s1958_s15 }
 0x3b2   : > { %p1960_p7 = pnand %p1959_p0, %p1747_p4  ;;  %p1967_p9 = por %p1966_p6, %p1965_p3 }
 0x3b4   : > { %p1961_p2 = pneg %p1960_p7 }
 0x3b6   : > { %p1968_p8 = pnand %p1967_p9, %p1961_p2 }
 0x3b8   : > { %1971 = shalt.err (!%p1968_p8)
}
 0x3b9   : > { %s2099_s17 = smov 128   ;;  %s2100_s8 = smov 8  }
 0x3ba   : > { %1714 = dma.vmem_to_hbm [thread:$0]  (%p1747_p4), %s1275_s9, 256, %s2730_s6, [#allocation7], %s2099_s17, %s2099_s17, %s2100_s8  }
 0x3bb   : > { %s2101_s23 = smov [#allocation15]  }
 0x3bc   : > { %s1290_s12 = sshll.u32 %s2101_s23, 4  ;;  %s1291_s12 = int_to_ptr.vmem [resolvable:$true] %s1290_s12 }
 0x3bd   : > { %s1982_s27 = scalar_lea.vmem %s1291_s12, 256  ;;  %p1989_p5 = scmp.lt.s32.totalorder %s1291_s12, %s1291_s12 }
 0x3be   : > { %p1983_p10 = scmp.ne.s32.totalorder %s1291_s12, %s1982_s27  ;;  %p1990_p13 = scmp.lt.s32.totalorder %s1982_s27, %s1982_s27 }
 0x3c0   : > { %p1984_p11 = pnand %p1983_p10, %p1747_p4  ;;  %p1991_p1 = por %p1990_p13, %p1989_p5 }
 0x3c2   : > { %p1985_p12 = pneg %p1984_p11 }
 0x3c4   : > { %p1992_p0 = pnand %p1991_p1, %p1985_p12 }
 0x3c6   : > { %1995 = shalt.err (!%p1992_p0)
}
 0x3c7   : > { %1716 = dma.vmem_to_hbm [thread:$0]  (%p1747_p4), %s1291_s12, 256, %s2731_s7, [#allocation16], %s2099_s17, %s2099_s17, %s2100_s8  }
 0x3c8   : > { %2051 = dma.done.wait (%p1747_p4), [#allocation7], 256  }
 0x3c9   : > { %2053 = vsyncadd (%p1747_p4), [#allocation7], 4294967040 }
 0x3ca   : > { %2055 = dma.done.wait (%p1747_p4), [#allocation16], 256  }
 0x3cb   : > { %2057 = vsyncadd (%p1747_p4), [#allocation16], 4294967040 }
 0x3cc PF: > { %s23_s29 = sadd.s32 1, %s2080_s29   ;;  %s2746_s24 = smov %s2064_s25 }
 0x3cd   : > { %p20_p7 = scmp.ge.s32.totalorder %s23_s29, 5   ;;  %s2747_s25 = smov %s2068_s26 }
 0x3ce   : > { %s2748_s26 = smov %s2255_s13  ;;  %s2749_s27 = smov %s2076_s28 }
 0x3cf   : > { %s2750_s28 = smov %s2752_s21  ;;  %22 = sbr.rel (!%p20_p7) target bundleno = 7 (0x7), region = 123 }
 0x3d4   :  { %1310 = vsyncpa [#allocation6], 1 }
 0x3d5   :  { %1312 = vsyncpa [#allocation6 + $0x1], 1 }
 0x3d6   :  { %1313 = vsyncpa [#allocation9], 1 }
 0x3d7   :  { %1314 = vsyncpa [#allocation13], 1 }
 0x3d8   :  { %1315 = vsyncpa [#allocation7], 1 }
 0x3d9   :  { %1317 = vsyncpa [#allocation7 + $0x1], 1 }
 0x3da   :  { %1318 = vsyncpa [#allocation16], 1 }

</bundles_post_ra>
